<compile_context>
chip_gen: v7x
topology: tpu7x:2x2x1
jax: 0.10.0
libtpu: 0.0.40
codegen_flags: <defaults>
</compile_context>

<pallas_src>
from functools import partial

import jax
import jax.numpy as jnp
from jax import lax
from jax.experimental import pallas as pl
from jax.experimental.pallas import tpu as pltpu

EPS = 1e-5
_VMEM_SPEC = pl.BlockSpec(memory_space=pltpu.MemorySpace.VMEM)


# ---------------------------------------------------------------------------
# Per-generation configuration helpers
# ---------------------------------------------------------------------------
def _vmem_capacity():
    try:
        return int(pltpu.get_tpu_info().vmem_capacity_bytes)
    except Exception:
        return 64 * 1024 * 1024  # conservative fallback


def _vmem_limit_bytes():
    cap = _vmem_capacity()
    # ~3/4 of physical per-core VMEM, capped at 100 MiB, floor 32 MiB.
    return max(32 * 1024 * 1024, min((cap * 3) // 4, 100 * 1024 * 1024))


def _layers_per_call():
    # v5e/v6e (128 MiB VMEM): fuse 2 layers per call; v7x (64 MiB): keep 1.
    return 2 if _vmem_capacity() >= 100 * 1024 * 1024 else 1


_VMEM_LIMIT = _vmem_limit_bytes()
_PAR1 = pltpu.CompilerParams(dimension_semantics=("parallel",),
                             vmem_limit_bytes=_VMEM_LIMIT)
_NOGRID = pltpu.CompilerParams(vmem_limit_bytes=_VMEM_LIMIT)


def _const_idx(nd):
    """Constant index_map -> weight block stays resident across grid steps."""
    return lambda n: (0,) * nd


# Probe once whether pipeline_mode=pl.Buffered(1) is supported; fall back to
# default double-buffering if not (correctness identical, only VMEM use differs).
_BUFFERED_OK = None


def _probe_buffered():
    try:
        def k(x_ref, w_ref, o_ref):
            o_ref[...] = x_ref[...] + w_ref[...]
        spec_w = pl.BlockSpec((8, 128), lambda i: (0, 0),
                              pipeline_mode=pl.Buffered(1))
        f = pl.pallas_call(
            k, out_shape=jax.ShapeDtypeStruct((16, 128), jnp.float32),
            grid=(2,),
            in_specs=[pl.BlockSpec((8, 128), lambda i: (i, 0)), spec_w],
            out_specs=pl.BlockSpec((8, 128), lambda i: (i, 0)))
        jax.block_until_ready(f(jnp.zeros((16, 128), jnp.float32),
                                jnp.zeros((8, 128), jnp.float32)))
        return True
    except Exception:
        return False


def _weight_spec(shape):
    """Full-array, constant-index, single-buffered spec for resident weights."""
    global _BUFFERED_OK
    if _BUFFERED_OK is None:
        _BUFFERED_OK = _probe_buffered()
    if _BUFFERED_OK:
        return pl.BlockSpec(shape, _const_idx(len(shape)),
                            pipeline_mode=pl.Buffered(1))
    return pl.BlockSpec(shape, _const_idx(len(shape)))


def _ln_rows(x, g, b):
    """Row-wise LayerNorm, f32 math, biased variance, eps=1e-5 (PyTorch)."""
    mu = jnp.mean(x, axis=-1, keepdims=True)
    var = jnp.mean(jnp.square(x - mu), axis=-1, keepdims=True)
    return (x - mu) * lax.rsqrt(var + EPS) * g + b


# ---------------------------------------------------------------------------
# Kernel 1: patch-embed matmul + (cls + positional) add + ln_pre   (per image)
# ---------------------------------------------------------------------------
def _embed_kernel(p_ref, w_ref, cp_ref, g_ref, b_ref, o_ref):
    # p_ref: (L, C*p*p) bf16 (row 0 is a zero row standing in for the CLS slot)
    # cp_ref: (L, width) f32 = positional embedding with class_embedding folded
    #         into row 0, so  zeros @ conv_w + cp[0] == cls + pos[0].
    x = jnp.dot(p_ref[...], w_ref[...], preferred_element_type=jnp.float32)
    x = x + cp_ref[...]
    o_ref[...] = _ln_rows(x, g_ref[...], b_ref[...])


def embed_images(params, imgs):
    """imgs: (N, 3, H, W) f32 -> ln_pre'd tokens (N, L, width) f32."""
    cfg = params["cfg"]
    p, width = cfg["patch"], cfg["width"]
    N, C, H, W_img = imgs.shape
    gh, gw = H // p, W_img // p
    P = gh * gw
    L = P + 1
    cpp = C * p * p

    # conv1(kernel=stride=patch, bias=False) == patchify + matmul
    patches = (imgs.reshape(N, C, gh, p, gw, p)
                   .transpose(0, 2, 4, 1, 3, 5)
                   .reshape(N, P, cpp))
    # prepend a zero row per image -> becomes the CLS slot after the matmul
    patches = jnp.pad(patches, ((0, 0), (1, 0), (0, 0))).astype(jnp.bfloat16)

    conv_w = params["conv_w"]
    return pl.pallas_call(
        _embed_kernel,
        out_shape=jax.ShapeDtypeStruct((N, L, width), jnp.float32),
        grid=(N,),
        in_specs=[
            pl.BlockSpec((None, L, cpp), lambda n: (n, 0, 0)),
            _weight_spec(conv_w.shape),
            _weight_spec(params["cls_pos"].shape),
            _weight_spec(params["ln_pre_g"].shape),
            _weight_spec(params["ln_pre_b"].shape),
        ],
        out_specs=pl.BlockSpec((None, L, width), lambda n: (n, 0, 0)),
        compiler_params=_PAR1,
    )(patches, conv_w, params["cls_pos"], params["ln_pre_g"], params["ln_pre_b"])


# ---------------------------------------------------------------------------
# Kernel 2: fused transformer residual block(s)                    (per image)
#   Processes `num_layers` consecutive layers per call so the residual stream
#   never round-trips HBM between them.
# ---------------------------------------------------------------------------
def _blocks_kernel(x_ref, *refs, num_layers, heads, dh):
    f32, bf16 = jnp.float32, jnp.bfloat16
    o_ref = refs[-1]
    x = x_ref[...]                                     # (L, W) f32
    W = x.shape[-1]
    for l in range(num_layers):                        # static unroll over layers
        (ln1g, ln1b, wqkv, bqkv, wo, bo,
         ln2g, ln2b, w1, b1, w2, b2) = refs[12 * l: 12 * l + 12]

        # ---- attention: ln_1 -> fused QKV matmul -> per-head softmax ----
        y = _ln_rows(x, ln1g[...], ln1b[...]).astype(bf16)
        # single full-depth/full-width QKV matmul; softmax scale pre-folded
        # into the q columns of wqkv / bqkv at parameter-build time.
        qkv = jnp.dot(y, wqkv[...], preferred_element_type=f32) + bqkv[...]

        heads_out = []
        for h in range(heads):                         # heads is static
            qh = qkv[:, h * dh:(h + 1) * dh]
            kh = qkv[:, W + h * dh:W + (h + 1) * dh]
            vh = qkv[:, 2 * W + h * dh:2 * W + (h + 1) * dh]
            # scores = (q*scale) @ k^T   (contract last dims)
            s = lax.dot_general(qh.astype(bf16), kh.astype(bf16),
                                (((1,), (1,)), ((), ())),
                                preferred_element_type=f32)
            s = s - jnp.max(s, axis=-1, keepdims=True)  # f32 softmax
            e = jnp.exp(s)
            p = e * pl.reciprocal(jnp.sum(e, axis=-1, keepdims=True),
                                  approx=True)
            heads_out.append(jnp.dot(p.astype(bf16), vh.astype(bf16),
                                     preferred_element_type=f32))   # (L, dh)
        # concat heads along features, ONE (L,W)@(W,W) out-projection
        attn = jnp.concatenate(heads_out, axis=-1).astype(bf16)     # (L, W)
        x = x + jnp.dot(attn, wo[...], preferred_element_type=f32) + bo[...]

        # ---- MLP: ln_2 -> fc1 -> QuickGELU -> fc2 -> residual ----
        y2 = _ln_rows(x, ln2g[...], ln2b[...]).astype(bf16)
        h1 = jnp.dot(y2, w1[...], preferred_element_type=f32) + b1[...]
        h1 = h1 * jax.nn.sigmoid(1.702 * h1)           # QuickGELU, f32
        x = x + jnp.dot(h1.astype(bf16), w2[...],
                        preferred_element_type=f32) + b2[...]
    o_ref[...] = x


_BLOCK_KEYS = ("ln1_g", "ln1_b", "wqkv", "bqkv", "wo", "bo",
               "ln2_g", "ln2_b", "w1", "b1", "w2", "b2")


def transformer_blocks(x, layer_params, heads):
    """x: (N, L, W) f32 tokens -> (N, L, W) f32, applying len(layer_params) layers."""
    N, L, W = x.shape
    dh = W // heads
    weights = [lp[k] for lp in layer_params for k in _BLOCK_KEYS]
    in_specs = ([pl.BlockSpec((None, L, W), lambda n: (n, 0, 0))]
                + [_weight_spec(w.shape) for w in weights])
    return pl.pallas_call(
        partial(_blocks_kernel, num_layers=len(layer_params),
                heads=heads, dh=dh),
        out_shape=jax.ShapeDtypeStruct((N, L, W), jnp.float32),
        grid=(N,),
        in_specs=in_specs,
        out_specs=pl.BlockSpec((None, L, W), lambda n: (n, 0, 0)),
        compiler_params=_PAR1,
    )(x, *weights)


# ---------------------------------------------------------------------------
# Kernel 3 (fused head): ln_post + visual projection + max over views
#                        + classifier Linear + BatchNorm1d
# ---------------------------------------------------------------------------
def _head_kernel(cls_ref, g_ref, b_ref, proj_ref, w_ref, cb_ref,
                 bng_ref, bnb_ref, out_ref, pooled_ref, *, views):
    f32, bf16 = jnp.float32, jnp.bfloat16
    x = cls_ref[...]                                   # (B*V, width) f32
    y = _ln_rows(x, g_ref[...], b_ref[...])            # ln_post
    feats = jnp.dot(y.astype(bf16), proj_ref[...],
                    preferred_element_type=f32)        # (B*V, D) visual proj
    M, D = feats.shape
    pooled = jnp.max(feats.reshape(M // views, views, D), axis=1)
    pooled_ref[...] = pooled                           # output_tensor1 (f32)
    logits = jnp.dot(pooled.astype(bf16), w_ref[...],
                     preferred_element_type=f32) + cb_ref[...]
    # nn.BatchNorm1d default (training) state: batch stats, biased var, eps=1e-5
    mu = jnp.mean(logits, axis=0, keepdims=True)
    var = jnp.mean(jnp.square(logits - mu), axis=0, keepdims=True)
    out_ref[...] = (logits - mu) * lax.rsqrt(var + EPS) * bng_ref[...] + bnb_ref[...]


def head(cls_tok, views, params):
    M, _ = cls_tok.shape
    B = M // views
    D = params["proj"].shape[1]
    C = params["cls_w"].shape[1]
    return pl.pallas_call(
        partial(_head_kernel, views=views),
        out_shape=(jax.ShapeDtypeStruct((B, C), jnp.float32),
                   jax.ShapeDtypeStruct((B, D), jnp.float32)),
        in_specs=[_VMEM_SPEC] * 8,
        out_specs=(_VMEM_SPEC, _VMEM_SPEC),
        compiler_params=_NOGRID,
    )(cls_tok, params["ln_post_g"], params["ln_post_b"], params["proj"],
      params["cls_w"], params["cls_b"], params["bn_g"], params["bn_b"])


# ---------------------------------------------------------------------------
# CLIP_IMAGE.forward
# ---------------------------------------------------------------------------
def clip_image_forward(params, input_tensor):
    """input_tensor: (B, V, 3, H, W) -> (output_tensor, output_tensor1)."""
    B, V, C, H, W_img = input_tensor.shape
    imgs = input_tensor.reshape(-1, C, H, W_img)       # .view(-1, 3, 224, 224)

    x = embed_images(params, imgs)                     # (B*V, L, width)

    blocks = params["blocks"]
    lpc = _layers_per_call()                           # 2 on v5e/v6e, 1 on v7x
    for i in range(0, len(blocks), lpc):
        x = transformer_blocks(x, blocks[i:i + lpc], params["cfg"]["heads"])

    cls_tok = x[:, 0, :]                               # (B*V, width)
    # .squeeze(-1).squeeze(-1) is a no-op on 2-D features
    out, pooled32 = head(cls_tok, V, params)
    return out, pooled32


# ---------------------------------------------------------------------------
# Deterministic parameter construction (synthetic, scaled-down ViT-B/16),
# packed directly into the kernel-friendly bf16 layouts.
# ---------------------------------------------------------------------------
def init_params(key, *, patch=8, grid=2, width=32, layers=2, heads=4,
                out_dim=16, class_num=5):
    L = grid * grid + 1
    dh = width // heads
    cpp = 3 * patch * patch
    keys = iter(jax.random.split(key, 8 + 8 * layers))
    bf16 = jnp.bfloat16
    scale = dh ** -0.5

    def nrm(shape, s=0.02):
        return (s * jax.random.normal(next(keys), shape)).astype(jnp.float32)

    ones = lambda n: jnp.ones((1, n), jnp.float32)
    zeros = lambda n: jnp.zeros((1, n), jnp.float32)

    blocks = []
    for _ in range(layers):
        # column layout: y @ W ; columns ordered [q | k | v]
        in_proj_w = nrm((width, 3 * width))
        in_proj_b = jnp.zeros((3 * width,), jnp.float32)
        # fold the softmax scale into the q columns (weights and bias)
        wqkv = in_proj_w.at[:, :width].multiply(scale)
        bqkv = in_proj_b.at[:width].multiply(scale)
        blocks.append(dict(
            ln1_g=ones(width), ln1_b=zeros(width),
            wqkv=wqkv.astype(bf16),
            bqkv=bqkv.reshape(1, 3 * width),
            wo=nrm((width, width)).astype(bf16),       # out_proj as plain (W,W)
            bo=zeros(width),
            ln2_g=ones(width), ln2_b=zeros(width),
            w1=nrm((width, 4 * width)).astype(bf16), b1=zeros(4 * width),
            w2=nrm((4 * width, width)).astype(bf16), b2=zeros(width),
        ))

    class_embedding = nrm((width,), s=width ** -0.5)
    pos_embedding = nrm((L, width), s=width ** -0.5)
    # fold the class embedding into row 0 of the positional embedding so the
    # embed kernel needs no in-kernel concatenation.
    cls_pos = pos_embedding.at[0].add(class_embedding)

    return dict(
        cfg=dict(patch=patch, width=width, heads=heads),
        conv_w=nrm((cpp, width)).astype(bf16),         # Conv2d weight, bias=False
        cls_pos=cls_pos,
        ln_pre_g=ones(width), ln_pre_b=zeros(width),
        blocks=blocks,
        ln_post_g=ones(width), ln_post_b=zeros(width),
        proj=nrm((width, out_dim), s=width ** -0.5).astype(bf16),
        cls_w=nrm((out_dim, class_num)).astype(bf16),  # nn.Linear(512, class_num)
        cls_b=zeros(class_num),
        bn_g=ones(class_num), bn_b=zeros(class_num),   # BatchNorm1d affine init
    )
    # TODO(synk): requires_grad freezing and fp16 weight conversion are
    # training-time concerns with no forward-pass equivalent; omitted.


if __name__ == "__main__":
    key = jax.random.PRNGKey(0)
    pkey, xkey = jax.random.split(key)

    # Small shapes consistent with the forward: (batch=2, views=2, 3, 16, 16),
    # patch=8 -> 2x2 grid (+cls = 5 tokens), width=32, 2 layers, 4 heads,
    # feature dim 16 (stand-in for 512), class_num=5.
    params = init_params(pkey)
    input_tensor = jax.random.normal(xkey, (2, 2, 3, 16, 16), dtype=jnp.float32)

    fwd = jax.jit(lambda inp: clip_image_forward(params, inp))
    out, feats = fwd(input_tensor)
    jax.block_until_ready((out, feats))
    assert out.shape == (2, 5) and feats.shape == (2, 16)
    assert bool(jnp.all(jnp.isfinite(out))) and bool(jnp.all(jnp.isfinite(feats)))
    print("KERNEL_OK")
</pallas_src>

<mosaic_0001>
module attributes {stable_mosaic.version = 11 : i64} {
  func.func @_blocks_kernel(%arg0: i32, %arg1: memref<1x5x32xf32, #tpu.memory_space<vmem>>, %arg2: memref<1x32xf32, #tpu.memory_space<vmem>>, %arg3: memref<1x32xf32, #tpu.memory_space<vmem>>, %arg4: memref<32x96xbf16, #tpu.memory_space<vmem>>, %arg5: memref<1x96xf32, #tpu.memory_space<vmem>>, %arg6: memref<32x32xbf16, #tpu.memory_space<vmem>>, %arg7: memref<1x32xf32, #tpu.memory_space<vmem>>, %arg8: memref<1x32xf32, #tpu.memory_space<vmem>>, %arg9: memref<1x32xf32, #tpu.memory_space<vmem>>, %arg10: memref<32x128xbf16, #tpu.memory_space<vmem>>, %arg11: memref<1x128xf32, #tpu.memory_space<vmem>>, %arg12: memref<128x32xbf16, #tpu.memory_space<vmem>>, %arg13: memref<1x32xf32, #tpu.memory_space<vmem>>, %arg14: memref<1x5x32xf32, #tpu.memory_space<vmem>>) attributes {dimension_semantics = [#tpu.dimension_semantics<parallel>], iteration_bounds = array<i64: 4>, scalar_prefetch = 0 : i64, scratch_operands = 0 : i64, tpu.core_type = #tpu.core_type<tc>, window_params = [{transform_indices = @transform_0, window_bounds = array<i64: 1, 5, 32>}, {pipeline_mode = #tpu.pipeline_mode<synchronous>, transform_indices = @transform_1, window_bounds = array<i64: 1, 32>}, {pipeline_mode = #tpu.pipeline_mode<synchronous>, transform_indices = @transform_2, window_bounds = array<i64: 1, 32>}, {pipeline_mode = #tpu.pipeline_mode<synchronous>, transform_indices = @transform_3, window_bounds = array<i64: 32, 96>}, {pipeline_mode = #tpu.pipeline_mode<synchronous>, transform_indices = @transform_4, window_bounds = array<i64: 1, 96>}, {pipeline_mode = #tpu.pipeline_mode<synchronous>, transform_indices = @transform_5, window_bounds = array<i64: 32, 32>}, {pipeline_mode = #tpu.pipeline_mode<synchronous>, transform_indices = @transform_6, window_bounds = array<i64: 1, 32>}, {pipeline_mode = #tpu.pipeline_mode<synchronous>, transform_indices = @transform_7, window_bounds = array<i64: 1, 32>}, {pipeline_mode = #tpu.pipeline_mode<synchronous>, transform_indices = @transform_8, window_bounds = array<i64: 1, 32>}, {pipeline_mode = #tpu.pipeline_mode<synchronous>, transform_indices = @transform_9, window_bounds = array<i64: 32, 128>}, {pipeline_mode = #tpu.pipeline_mode<synchronous>, transform_indices = @transform_10, window_bounds = array<i64: 1, 128>}, {pipeline_mode = #tpu.pipeline_mode<synchronous>, transform_indices = @transform_11, window_bounds = array<i64: 128, 32>}, {pipeline_mode = #tpu.pipeline_mode<synchronous>, transform_indices = @transform_12, window_bounds = array<i64: 1, 32>}, {transform_indices = @transform_13, window_bounds = array<i64: 1, 5, 32>}]} {
    %c0 = arith.constant 0 : index
    %c0_0 = arith.constant 0 : index
    %c0_1 = arith.constant 0 : index
    %0 = vector.load %arg1[%c0, %c0_0, %c0_1] : memref<1x5x32xf32, #tpu.memory_space<vmem>>, vector<1x5x32xf32>
    %1 = vector.shape_cast %0 : vector<1x5x32xf32> to vector<5x32xf32>
    %c0_2 = arith.constant 0 : index
    %c0_3 = arith.constant 0 : index
    %2 = vector.load %arg2[%c0_2, %c0_3] : memref<1x32xf32, #tpu.memory_space<vmem>>, vector<1x32xf32>
    %c0_4 = arith.constant 0 : index
    %c0_5 = arith.constant 0 : index
    %3 = vector.load %arg3[%c0_4, %c0_5] : memref<1x32xf32, #tpu.memory_space<vmem>>, vector<1x32xf32>
    %cst = arith.constant dense<0.000000e+00> : vector<5xf32>
    %4 = vector.multi_reduction <add>, %1, %cst [1] : vector<5x32xf32> to vector<5xf32>
    %5 = vector.shape_cast %4 : vector<5xf32> to vector<5x1xf32>
    %cst_6 = arith.constant 3.200000e+01 : f32
    %6 = vector.broadcast %cst_6 : f32 to vector<5x1xf32>
    %7 = arith.divf %5, %6 : vector<5x1xf32>
    %8 = vector.broadcast %7 : vector<5x1xf32> to vector<5x32xf32>
    %9 = arith.subf %1, %8 : vector<5x32xf32>
    %10 = arith.mulf %9, %9 : vector<5x32xf32>
    %cst_7 = arith.constant dense<0.000000e+00> : vector<5xf32>
    %11 = vector.multi_reduction <add>, %10, %cst_7 [1] : vector<5x32xf32> to vector<5xf32>
    %12 = vector.shape_cast %11 : vector<5xf32> to vector<5x1xf32>
    %cst_8 = arith.constant 3.200000e+01 : f32
    %13 = vector.broadcast %cst_8 : f32 to vector<5x1xf32>
    %14 = arith.divf %12, %13 : vector<5x1xf32>
    %15 = vector.broadcast %7 : vector<5x1xf32> to vector<5x32xf32>
    %16 = arith.subf %1, %15 : vector<5x32xf32>
    %cst_9 = arith.constant 9.99999974E-6 : f32
    %17 = vector.broadcast %cst_9 : f32 to vector<5x1xf32>
    %18 = arith.addf %14, %17 : vector<5x1xf32>
    %19 = math.rsqrt %18 : vector<5x1xf32>
    %20 = vector.broadcast %19 : vector<5x1xf32> to vector<5x32xf32>
    %21 = arith.mulf %16, %20 : vector<5x32xf32>
    %22 = vector.broadcast %2 : vector<1x32xf32> to vector<5x32xf32>
    %23 = arith.mulf %21, %22 : vector<5x32xf32>
    %24 = vector.broadcast %3 : vector<1x32xf32> to vector<5x32xf32>
    %25 = arith.addf %23, %24 : vector<5x32xf32>
    %26 = arith.truncf %25 : vector<5x32xf32> to vector<5x32xbf16>
    %c0_10 = arith.constant 0 : index
    %c0_11 = arith.constant 0 : index
    %27 = vector.load %arg4[%c0_10, %c0_11] : memref<32x96xbf16, #tpu.memory_space<vmem>>, vector<32x96xbf16>
    %cst_12 = arith.constant dense<0.000000e+00> : vector<5x96xf32>
    %28 = tpu.matmul %26, %27, %cst_12 {dimension_numbers = #tpu.dot_dimension_numbers<[1], [0], [0], [1], [0, 0, 1, 1], [], []>} : vector<5x32xbf16>, vector<32x96xbf16>, vector<5x96xf32> -> vector<5x96xf32>
    %c0_13 = arith.constant 0 : index
    %c0_14 = arith.constant 0 : index
    %29 = vector.load %arg5[%c0_13, %c0_14] : memref<1x96xf32, #tpu.memory_space<vmem>>, vector<1x96xf32>
    %30 = vector.broadcast %29 : vector<1x96xf32> to vector<5x96xf32>
    %31 = arith.addf %28, %30 : vector<5x96xf32>
    %32 = vector.extract_strided_slice %31 {offsets = [0, 0], sizes = [5, 8], strides = [1, 1]} : vector<5x96xf32> to vector<5x8xf32>
    %33 = vector.extract_strided_slice %31 {offsets = [0, 32], sizes = [5, 8], strides = [1, 1]} : vector<5x96xf32> to vector<5x8xf32>
    %34 = vector.extract_strided_slice %31 {offsets = [0, 64], sizes = [5, 8], strides = [1, 1]} : vector<5x96xf32> to vector<5x8xf32>
    %35 = arith.truncf %32 : vector<5x8xf32> to vector<5x8xbf16>
    %36 = arith.truncf %33 : vector<5x8xf32> to vector<5x8xbf16>
    %cst_15 = arith.constant dense<0.000000e+00> : vector<5x5xf32>
    %37 = tpu.matmul %35, %36, %cst_15 {dimension_numbers = #tpu.dot_dimension_numbers<[1], [1], [0], [0], [0, 0, 1, 0], [], []>} : vector<5x8xbf16>, vector<5x8xbf16>, vector<5x5xf32> -> vector<5x5xf32>
    %cst_16 = arith.constant dense<0xFF800000> : vector<5xf32>
    %38 = vector.multi_reduction <maximumf>, %37, %cst_16 [1] : vector<5x5xf32> to vector<5xf32>
    %39 = vector.shape_cast %38 : vector<5xf32> to vector<5x1xf32>
    %40 = vector.broadcast %39 : vector<5x1xf32> to vector<5x5xf32>
    %41 = arith.subf %37, %40 : vector<5x5xf32>
    %42 = math.exp %41 : vector<5x5xf32>
    %cst_17 = arith.constant dense<0.000000e+00> : vector<5xf32>
    %43 = vector.multi_reduction <add>, %42, %cst_17 [1] : vector<5x5xf32> to vector<5xf32>
    %44 = vector.shape_cast %43 : vector<5xf32> to vector<5x1xf32>
    %45 = tpu.reciprocal %44 {approx = true} : vector<5x1xf32> -> vector<5x1xf32>
    %46 = vector.broadcast %45 : vector<5x1xf32> to vector<5x5xf32>
    %47 = arith.mulf %42, %46 : vector<5x5xf32>
    %48 = arith.truncf %47 : vector<5x5xf32> to vector<5x5xbf16>
    %49 = arith.truncf %34 : vector<5x8xf32> to vector<5x8xbf16>
    %cst_18 = arith.constant dense<0.000000e+00> : vector<5x8xf32>
    %50 = tpu.matmul %48, %49, %cst_18 {dimension_numbers = #tpu.dot_dimension_numbers<[1], [0], [0], [1], [0, 0, 1, 1], [], []>} : vector<5x5xbf16>, vector<5x8xbf16>, vector<5x8xf32> -> vector<5x8xf32>
    %51 = vector.extract_strided_slice %31 {offsets = [0, 8], sizes = [5, 8], strides = [1, 1]} : vector<5x96xf32> to vector<5x8xf32>
    %52 = vector.extract_strided_slice %31 {offsets = [0, 40], sizes = [5, 8], strides = [1, 1]} : vector<5x96xf32> to vector<5x8xf32>
    %53 = vector.extract_strided_slice %31 {offsets = [0, 72], sizes = [5, 8], strides = [1, 1]} : vector<5x96xf32> to vector<5x8xf32>
    %54 = arith.truncf %51 : vector<5x8xf32> to vector<5x8xbf16>
    %55 = arith.truncf %52 : vector<5x8xf32> to vector<5x8xbf16>
    %cst_19 = arith.constant dense<0.000000e+00> : vector<5x5xf32>
    %56 = tpu.matmul %54, %55, %cst_19 {dimension_numbers = #tpu.dot_dimension_numbers<[1], [1], [0], [0], [0, 0, 1, 0], [], []>} : vector<5x8xbf16>, vector<5x8xbf16>, vector<5x5xf32> -> vector<5x5xf32>
    %cst_20 = arith.constant dense<0xFF800000> : vector<5xf32>
    %57 = vector.multi_reduction <maximumf>, %56, %cst_20 [1] : vector<5x5xf32> to vector<5xf32>
    %58 = vector.shape_cast %57 : vector<5xf32> to vector<5x1xf32>
    %59 = vector.broadcast %58 : vector<5x1xf32> to vector<5x5xf32>
    %60 = arith.subf %56, %59 : vector<5x5xf32>
    %61 = math.exp %60 : vector<5x5xf32>
    %cst_21 = arith.constant dense<0.000000e+00> : vector<5xf32>
    %62 = vector.multi_reduction <add>, %61, %cst_21 [1] : vector<5x5xf32> to vector<5xf32>
    %63 = vector.shape_cast %62 : vector<5xf32> to vector<5x1xf32>
    %64 = tpu.reciprocal %63 {approx = true} : vector<5x1xf32> -> vector<5x1xf32>
    %65 = vector.broadcast %64 : vector<5x1xf32> to vector<5x5xf32>
    %66 = arith.mulf %61, %65 : vector<5x5xf32>
    %67 = arith.truncf %66 : vector<5x5xf32> to vector<5x5xbf16>
    %68 = arith.truncf %53 : vector<5x8xf32> to vector<5x8xbf16>
    %cst_22 = arith.constant dense<0.000000e+00> : vector<5x8xf32>
    %69 = tpu.matmul %67, %68, %cst_22 {dimension_numbers = #tpu.dot_dimension_numbers<[1], [0], [0], [1], [0, 0, 1, 1], [], []>} : vector<5x5xbf16>, vector<5x8xbf16>, vector<5x8xf32> -> vector<5x8xf32>
    %70 = vector.extract_strided_slice %31 {offsets = [0, 16], sizes = [5, 8], strides = [1, 1]} : vector<5x96xf32> to vector<5x8xf32>
    %71 = vector.extract_strided_slice %31 {offsets = [0, 48], sizes = [5, 8], strides = [1, 1]} : vector<5x96xf32> to vector<5x8xf32>
    %72 = vector.extract_strided_slice %31 {offsets = [0, 80], sizes = [5, 8], strides = [1, 1]} : vector<5x96xf32> to vector<5x8xf32>
    %73 = arith.truncf %70 : vector<5x8xf32> to vector<5x8xbf16>
    %74 = arith.truncf %71 : vector<5x8xf32> to vector<5x8xbf16>
    %cst_23 = arith.constant dense<0.000000e+00> : vector<5x5xf32>
    %75 = tpu.matmul %73, %74, %cst_23 {dimension_numbers = #tpu.dot_dimension_numbers<[1], [1], [0], [0], [0, 0, 1, 0], [], []>} : vector<5x8xbf16>, vector<5x8xbf16>, vector<5x5xf32> -> vector<5x5xf32>
    %cst_24 = arith.constant dense<0xFF800000> : vector<5xf32>
    %76 = vector.multi_reduction <maximumf>, %75, %cst_24 [1] : vector<5x5xf32> to vector<5xf32>
    %77 = vector.shape_cast %76 : vector<5xf32> to vector<5x1xf32>
    %78 = vector.broadcast %77 : vector<5x1xf32> to vector<5x5xf32>
    %79 = arith.subf %75, %78 : vector<5x5xf32>
    %80 = math.exp %79 : vector<5x5xf32>
    %cst_25 = arith.constant dense<0.000000e+00> : vector<5xf32>
    %81 = vector.multi_reduction <add>, %80, %cst_25 [1] : vector<5x5xf32> to vector<5xf32>
    %82 = vector.shape_cast %81 : vector<5xf32> to vector<5x1xf32>
    %83 = tpu.reciprocal %82 {approx = true} : vector<5x1xf32> -> vector<5x1xf32>
    %84 = vector.broadcast %83 : vector<5x1xf32> to vector<5x5xf32>
    %85 = arith.mulf %80, %84 : vector<5x5xf32>
    %86 = arith.truncf %85 : vector<5x5xf32> to vector<5x5xbf16>
    %87 = arith.truncf %72 : vector<5x8xf32> to vector<5x8xbf16>
    %cst_26 = arith.constant dense<0.000000e+00> : vector<5x8xf32>
    %88 = tpu.matmul %86, %87, %cst_26 {dimension_numbers = #tpu.dot_dimension_numbers<[1], [0], [0], [1], [0, 0, 1, 1], [], []>} : vector<5x5xbf16>, vector<5x8xbf16>, vector<5x8xf32> -> vector<5x8xf32>
    %89 = vector.extract_strided_slice %31 {offsets = [0, 24], sizes = [5, 8], strides = [1, 1]} : vector<5x96xf32> to vector<5x8xf32>
    %90 = vector.extract_strided_slice %31 {offsets = [0, 56], sizes = [5, 8], strides = [1, 1]} : vector<5x96xf32> to vector<5x8xf32>
    %91 = vector.extract_strided_slice %31 {offsets = [0, 88], sizes = [5, 8], strides = [1, 1]} : vector<5x96xf32> to vector<5x8xf32>
    %92 = arith.truncf %89 : vector<5x8xf32> to vector<5x8xbf16>
    %93 = arith.truncf %90 : vector<5x8xf32> to vector<5x8xbf16>
    %cst_27 = arith.constant dense<0.000000e+00> : vector<5x5xf32>
    %94 = tpu.matmul %92, %93, %cst_27 {dimension_numbers = #tpu.dot_dimension_numbers<[1], [1], [0], [0], [0, 0, 1, 0], [], []>} : vector<5x8xbf16>, vector<5x8xbf16>, vector<5x5xf32> -> vector<5x5xf32>
    %cst_28 = arith.constant dense<0xFF800000> : vector<5xf32>
    %95 = vector.multi_reduction <maximumf>, %94, %cst_28 [1] : vector<5x5xf32> to vector<5xf32>
    %96 = vector.shape_cast %95 : vector<5xf32> to vector<5x1xf32>
    %97 = vector.broadcast %96 : vector<5x1xf32> to vector<5x5xf32>
    %98 = arith.subf %94, %97 : vector<5x5xf32>
    %99 = math.exp %98 : vector<5x5xf32>
    %cst_29 = arith.constant dense<0.000000e+00> : vector<5xf32>
    %100 = vector.multi_reduction <add>, %99, %cst_29 [1] : vector<5x5xf32> to vector<5xf32>
    %101 = vector.shape_cast %100 : vector<5xf32> to vector<5x1xf32>
    %102 = tpu.reciprocal %101 {approx = true} : vector<5x1xf32> -> vector<5x1xf32>
    %103 = vector.broadcast %102 : vector<5x1xf32> to vector<5x5xf32>
    %104 = arith.mulf %99, %103 : vector<5x5xf32>
    %105 = arith.truncf %104 : vector<5x5xf32> to vector<5x5xbf16>
    %106 = arith.truncf %91 : vector<5x8xf32> to vector<5x8xbf16>
    %cst_30 = arith.constant dense<0.000000e+00> : vector<5x8xf32>
    %107 = tpu.matmul %105, %106, %cst_30 {dimension_numbers = #tpu.dot_dimension_numbers<[1], [0], [0], [1], [0, 0, 1, 1], [], []>} : vector<5x5xbf16>, vector<5x8xbf16>, vector<5x8xf32> -> vector<5x8xf32>
    %108 = tpu.concatenate %50, %69, %88, %107 in 1 : vector<5x8xf32>, vector<5x8xf32>, vector<5x8xf32>, vector<5x8xf32> -> vector<5x32xf32>
    %109 = arith.truncf %108 : vector<5x32xf32> to vector<5x32xbf16>
    %c0_31 = arith.constant 0 : index
    %c0_32 = arith.constant 0 : index
    %110 = vector.load %arg6[%c0_31, %c0_32] : memref<32x32xbf16, #tpu.memory_space<vmem>>, vector<32x32xbf16>
    %cst_33 = arith.constant dense<0.000000e+00> : vector<5x32xf32>
    %111 = tpu.matmul %109, %110, %cst_33 {dimension_numbers = #tpu.dot_dimension_numbers<[1], [0], [0], [1], [0, 0, 1, 1], [], []>} : vector<5x32xbf16>, vector<32x32xbf16>, vector<5x32xf32> -> vector<5x32xf32>
    %112 = arith.addf %1, %111 : vector<5x32xf32>
    %c0_34 = arith.constant 0 : index
    %c0_35 = arith.constant 0 : index
    %113 = vector.load %arg7[%c0_34, %c0_35] : memref<1x32xf32, #tpu.memory_space<vmem>>, vector<1x32xf32>
    %114 = vector.broadcast %113 : vector<1x32xf32> to vector<5x32xf32>
    %115 = arith.addf %112, %114 : vector<5x32xf32>
    %c0_36 = arith.constant 0 : index
    %c0_37 = arith.constant 0 : index
    %116 = vector.load %arg8[%c0_36, %c0_37] : memref<1x32xf32, #tpu.memory_space<vmem>>, vector<1x32xf32>
    %c0_38 = arith.constant 0 : index
    %c0_39 = arith.constant 0 : index
    %117 = vector.load %arg9[%c0_38, %c0_39] : memref<1x32xf32, #tpu.memory_space<vmem>>, vector<1x32xf32>
    %cst_40 = arith.constant dense<0.000000e+00> : vector<5xf32>
    %118 = vector.multi_reduction <add>, %115, %cst_40 [1] : vector<5x32xf32> to vector<5xf32>
    %119 = vector.shape_cast %118 : vector<5xf32> to vector<5x1xf32>
    %cst_41 = arith.constant 3.200000e+01 : f32
    %120 = vector.broadcast %cst_41 : f32 to vector<5x1xf32>
    %121 = arith.divf %119, %120 : vector<5x1xf32>
    %122 = vector.broadcast %121 : vector<5x1xf32> to vector<5x32xf32>
    %123 = arith.subf %115, %122 : vector<5x32xf32>
    %124 = arith.mulf %123, %123 : vector<5x32xf32>
    %cst_42 = arith.constant dense<0.000000e+00> : vector<5xf32>
    %125 = vector.multi_reduction <add>, %124, %cst_42 [1] : vector<5x32xf32> to vector<5xf32>
    %126 = vector.shape_cast %125 : vector<5xf32> to vector<5x1xf32>
    %cst_43 = arith.constant 3.200000e+01 : f32
    %127 = vector.broadcast %cst_43 : f32 to vector<5x1xf32>
    %128 = arith.divf %126, %127 : vector<5x1xf32>
    %129 = vector.broadcast %121 : vector<5x1xf32> to vector<5x32xf32>
    %130 = arith.subf %115, %129 : vector<5x32xf32>
    %cst_44 = arith.constant 9.99999974E-6 : f32
    %131 = vector.broadcast %cst_44 : f32 to vector<5x1xf32>
    %132 = arith.addf %128, %131 : vector<5x1xf32>
    %133 = math.rsqrt %132 : vector<5x1xf32>
    %134 = vector.broadcast %133 : vector<5x1xf32> to vector<5x32xf32>
    %135 = arith.mulf %130, %134 : vector<5x32xf32>
    %136 = vector.broadcast %116 : vector<1x32xf32> to vector<5x32xf32>
    %137 = arith.mulf %135, %136 : vector<5x32xf32>
    %138 = vector.broadcast %117 : vector<1x32xf32> to vector<5x32xf32>
    %139 = arith.addf %137, %138 : vector<5x32xf32>
    %140 = arith.truncf %139 : vector<5x32xf32> to vector<5x32xbf16>
    %c0_45 = arith.constant 0 : index
    %c0_46 = arith.constant 0 : index
    %141 = vector.load %arg10[%c0_45, %c0_46] : memref<32x128xbf16, #tpu.memory_space<vmem>>, vector<32x128xbf16>
    %cst_47 = arith.constant dense<0.000000e+00> : vector<5x128xf32>
    %142 = tpu.matmul %140, %141, %cst_47 {dimension_numbers = #tpu.dot_dimension_numbers<[1], [0], [0], [1], [0, 0, 1, 1], [], []>} : vector<5x32xbf16>, vector<32x128xbf16>, vector<5x128xf32> -> vector<5x128xf32>
    %c0_48 = arith.constant 0 : index
    %c0_49 = arith.constant 0 : index
    %143 = vector.load %arg11[%c0_48, %c0_49] : memref<1x128xf32, #tpu.memory_space<vmem>>, vector<1x128xf32>
    %144 = vector.broadcast %143 : vector<1x128xf32> to vector<5x128xf32>
    %145 = arith.addf %142, %144 : vector<5x128xf32>
    %cst_50 = arith.constant 1.702000e+00 : f32
    %146 = vector.broadcast %cst_50 : f32 to vector<5x128xf32>
    %147 = arith.mulf %146, %145 : vector<5x128xf32>
    %148 = arith.negf %147 : vector<5x128xf32>
    %149 = math.exp %148 : vector<5x128xf32>
    %cst_51 = arith.constant 1.000000e+00 : f32
    %150 = vector.broadcast %cst_51 : f32 to vector<5x128xf32>
    %151 = arith.addf %150, %149 : vector<5x128xf32>
    %152 = arith.divf %150, %151 : vector<5x128xf32>
    %153 = arith.mulf %145, %152 : vector<5x128xf32>
    %154 = arith.truncf %153 : vector<5x128xf32> to vector<5x128xbf16>
    %c0_52 = arith.constant 0 : index
    %c0_53 = arith.constant 0 : index
    %155 = vector.load %arg12[%c0_52, %c0_53] : memref<128x32xbf16, #tpu.memory_space<vmem>>, vector<128x32xbf16>
    %cst_54 = arith.constant dense<0.000000e+00> : vector<5x32xf32>
    %156 = tpu.matmul %154, %155, %cst_54 {dimension_numbers = #tpu.dot_dimension_numbers<[1], [0], [0], [1], [0, 0, 1, 1], [], []>} : vector<5x128xbf16>, vector<128x32xbf16>, vector<5x32xf32> -> vector<5x32xf32>
    %157 = arith.addf %115, %156 : vector<5x32xf32>
    %c0_55 = arith.constant 0 : index
    %c0_56 = arith.constant 0 : index
    %158 = vector.load %arg13[%c0_55, %c0_56] : memref<1x32xf32, #tpu.memory_space<vmem>>, vector<1x32xf32>
    %159 = vector.broadcast %158 : vector<1x32xf32> to vector<5x32xf32>
    %160 = arith.addf %157, %159 : vector<5x32xf32>
    %c0_57 = arith.constant 0 : index
    %c0_58 = arith.constant 0 : index
    %c0_59 = arith.constant 0 : index
    %161 = vector.load %arg14[%c0_57, %c0_58, %c0_59] : memref<1x5x32xf32, #tpu.memory_space<vmem>>, vector<1x5x32xf32>
    %162 = vector.shape_cast %161 : vector<1x5x32xf32> to vector<5x32xf32>
    %163 = vector.shape_cast %160 : vector<5x32xf32> to vector<1x5x32xf32>
    tpu.vector_store %arg14[%c0_57, %c0_58, %c0_59], %163 {strides = array<i32>} : memref<1x5x32xf32, #tpu.memory_space<vmem>>, vector<1x5x32xf32>,
    return
  }
  func.func @transform_0(%arg0: i32) -> (i32, i32, i32) {
    %c0_i32 = arith.constant 0 : i32
    %c0_i32_0 = arith.constant 0 : i32
    %c0_i32_1 = arith.constant 0 : i32
    return %arg0, %c0_i32, %c0_i32_0 : i32, i32, i32
  }
  func.func @transform_1(%arg0: i32) -> (i32, i32) {
    %c0_i32 = arith.constant 0 : i32
    %c0_i32_0 = arith.constant 0 : i32
    %c0_i32_1 = arith.constant 0 : i32
    return %c0_i32, %c0_i32_0 : i32, i32
  }
  func.func @transform_2(%arg0: i32) -> (i32, i32) {
    %c0_i32 = arith.constant 0 : i32
    %c0_i32_0 = arith.constant 0 : i32
    %c0_i32_1 = arith.constant 0 : i32
    return %c0_i32, %c0_i32_0 : i32, i32
  }
  func.func @transform_3(%arg0: i32) -> (i32, i32) {
    %c0_i32 = arith.constant 0 : i32
    %c0_i32_0 = arith.constant 0 : i32
    %c0_i32_1 = arith.constant 0 : i32
    return %c0_i32, %c0_i32_0 : i32, i32
  }
  func.func @transform_4(%arg0: i32) -> (i32, i32) {
    %c0_i32 = arith.constant 0 : i32
    %c0_i32_0 = arith.constant 0 : i32
    %c0_i32_1 = arith.constant 0 : i32
    return %c0_i32, %c0_i32_0 : i32, i32
  }
  func.func @transform_5(%arg0: i32) -> (i32, i32) {
    %c0_i32 = arith.constant 0 : i32
    %c0_i32_0 = arith.constant 0 : i32
    %c0_i32_1 = arith.constant 0 : i32
    return %c0_i32, %c0_i32_0 : i32, i32
  }
  func.func @transform_6(%arg0: i32) -> (i32, i32) {
    %c0_i32 = arith.constant 0 : i32
    %c0_i32_0 = arith.constant 0 : i32
    %c0_i32_1 = arith.constant 0 : i32
    return %c0_i32, %c0_i32_0 : i32, i32
  }
  func.func @transform_7(%arg0: i32) -> (i32, i32) {
    %c0_i32 = arith.constant 0 : i32
    %c0_i32_0 = arith.constant 0 : i32
    %c0_i32_1 = arith.constant 0 : i32
    return %c0_i32, %c0_i32_0 : i32, i32
  }
  func.func @transform_8(%arg0: i32) -> (i32, i32) {
    %c0_i32 = arith.constant 0 : i32
    %c0_i32_0 = arith.constant 0 : i32
    %c0_i32_1 = arith.constant 0 : i32
    return %c0_i32, %c0_i32_0 : i32, i32
  }
  func.func @transform_9(%arg0: i32) -> (i32, i32) {
    %c0_i32 = arith.constant 0 : i32
    %c0_i32_0 = arith.constant 0 : i32
    %c0_i32_1 = arith.constant 0 : i32
    return %c0_i32, %c0_i32_0 : i32, i32
  }
  func.func @transform_10(%arg0: i32) -> (i32, i32) {
    %c0_i32 = arith.constant 0 : i32
    %c0_i32_0 = arith.constant 0 : i32
    %c0_i32_1 = arith.constant 0 : i32
    return %c0_i32, %c0_i32_0 : i32, i32
  }
  func.func @transform_11(%arg0: i32) -> (i32, i32) {
    %c0_i32 = arith.constant 0 : i32
    %c0_i32_0 = arith.constant 0 : i32
    %c0_i32_1 = arith.constant 0 : i32
    return %c0_i32, %c0_i32_0 : i32, i32
  }
  func.func @transform_12(%arg0: i32) -> (i32, i32) {
    %c0_i32 = arith.constant 0 : i32
    %c0_i32_0 = arith.constant 0 : i32
    %c0_i32_1 = arith.constant 0 : i32
    return %c0_i32, %c0_i32_0 : i32, i32
  }
  func.func @transform_13(%arg0: i32) -> (i32, i32, i32) {
    %c0_i32 = arith.constant 0 : i32
    %c0_i32_0 = arith.constant 0 : i32
    %c0_i32_1 = arith.constant 0 : i32
    return %arg0, %c0_i32, %c0_i32_0 : i32, i32, i32
  }
}

module attributes {stable_mosaic.version = 11 : i64} {
  func.func @_embed_kernel(%arg0: i32, %arg1: memref<1x5x192xbf16, #tpu.memory_space<vmem>>, %arg2: memref<192x32xbf16, #tpu.memory_space<vmem>>, %arg3: memref<5x32xf32, #tpu.memory_space<vmem>>, %arg4: memref<1x32xf32, #tpu.memory_space<vmem>>, %arg5: memref<1x32xf32, #tpu.memory_space<vmem>>, %arg6: memref<1x5x32xf32, #tpu.memory_space<vmem>>) attributes {dimension_semantics = [#tpu.dimension_semantics<parallel>], iteration_bounds = array<i64: 4>, scalar_prefetch = 0 : i64, scratch_operands = 0 : i64, tpu.core_type = #tpu.core_type<tc>, window_params = [{transform_indices = @transform_0, window_bounds = array<i64: 1, 5, 192>}, {pipeline_mode = #tpu.pipeline_mode<synchronous>, transform_indices = @transform_1, window_bounds = array<i64: 192, 32>}, {pipeline_mode = #tpu.pipeline_mode<synchronous>, transform_indices = @transform_2, window_bounds = array<i64: 5, 32>}, {pipeline_mode = #tpu.pipeline_mode<synchronous>, transform_indices = @transform_3, window_bounds = array<i64: 1, 32>}, {pipeline_mode = #tpu.pipeline_mode<synchronous>, transform_indices = @transform_4, window_bounds = array<i64: 1, 32>}, {transform_indices = @transform_5, window_bounds = array<i64: 1, 5, 32>}]} {
    %c0 = arith.constant 0 : index
    %c0_0 = arith.constant 0 : index
    %c0_1 = arith.constant 0 : index
    %0 = vector.load %arg1[%c0, %c0_0, %c0_1] : memref<1x5x192xbf16, #tpu.memory_space<vmem>>, vector<1x5x192xbf16>
    %1 = vector.shape_cast %0 : vector<1x5x192xbf16> to vector<5x192xbf16>
    %c0_2 = arith.constant 0 : index
    %c0_3 = arith.constant 0 : index
    %2 = vector.load %arg2[%c0_2, %c0_3] : memref<192x32xbf16, #tpu.memory_space<vmem>>, vector<192x32xbf16>
    %cst = arith.constant dense<0.000000e+00> : vector<5x32xf32>
    %3 = tpu.matmul %1, %2, %cst {dimension_numbers = #tpu.dot_dimension_numbers<[1], [0], [0], [1], [0, 0, 1, 1], [], []>} : vector<5x192xbf16>, vector<192x32xbf16>, vector<5x32xf32> -> vector<5x32xf32>
    %c0_4 = arith.constant 0 : index
    %c0_5 = arith.constant 0 : index
    %4 = vector.load %arg3[%c0_4, %c0_5] : memref<5x32xf32, #tpu.memory_space<vmem>>, vector<5x32xf32>
    %5 = arith.addf %3, %4 : vector<5x32xf32>
    %c0_6 = arith.constant 0 : index
    %c0_7 = arith.constant 0 : index
    %6 = vector.load %arg4[%c0_6, %c0_7] : memref<1x32xf32, #tpu.memory_space<vmem>>, vector<1x32xf32>
    %c0_8 = arith.constant 0 : index
    %c0_9 = arith.constant 0 : index
    %7 = vector.load %arg5[%c0_8, %c0_9] : memref<1x32xf32, #tpu.memory_space<vmem>>, vector<1x32xf32>
    %cst_10 = arith.constant dense<0.000000e+00> : vector<5xf32>
    %8 = vector.multi_reduction <add>, %5, %cst_10 [1] : vector<5x32xf32> to vector<5xf32>
    %9 = vector.shape_cast %8 : vector<5xf32> to vector<5x1xf32>
    %cst_11 = arith.constant 3.200000e+01 : f32
    %10 = vector.broadcast %cst_11 : f32 to vector<5x1xf32>
    %11 = arith.divf %9, %10 : vector<5x1xf32>
    %12 = vector.broadcast %11 : vector<5x1xf32> to vector<5x32xf32>
    %13 = arith.subf %5, %12 : vector<5x32xf32>
    %14 = arith.mulf %13, %13 : vector<5x32xf32>
    %cst_12 = arith.constant dense<0.000000e+00> : vector<5xf32>
    %15 = vector.multi_reduction <add>, %14, %cst_12 [1] : vector<5x32xf32> to vector<5xf32>
    %16 = vector.shape_cast %15 : vector<5xf32> to vector<5x1xf32>
    %cst_13 = arith.constant 3.200000e+01 : f32
    %17 = vector.broadcast %cst_13 : f32 to vector<5x1xf32>
    %18 = arith.divf %16, %17 : vector<5x1xf32>
    %19 = vector.broadcast %11 : vector<5x1xf32> to vector<5x32xf32>
    %20 = arith.subf %5, %19 : vector<5x32xf32>
    %cst_14 = arith.constant 9.99999974E-6 : f32
    %21 = vector.broadcast %cst_14 : f32 to vector<5x1xf32>
    %22 = arith.addf %18, %21 : vector<5x1xf32>
    %23 = math.rsqrt %22 : vector<5x1xf32>
    %24 = vector.broadcast %23 : vector<5x1xf32> to vector<5x32xf32>
    %25 = arith.mulf %20, %24 : vector<5x32xf32>
    %26 = vector.broadcast %6 : vector<1x32xf32> to vector<5x32xf32>
    %27 = arith.mulf %25, %26 : vector<5x32xf32>
    %28 = vector.broadcast %7 : vector<1x32xf32> to vector<5x32xf32>
    %29 = arith.addf %27, %28 : vector<5x32xf32>
    %c0_15 = arith.constant 0 : index
    %c0_16 = arith.constant 0 : index
    %c0_17 = arith.constant 0 : index
    %30 = vector.load %arg6[%c0_15, %c0_16, %c0_17] : memref<1x5x32xf32, #tpu.memory_space<vmem>>, vector<1x5x32xf32>
    %31 = vector.shape_cast %30 : vector<1x5x32xf32> to vector<5x32xf32>
    %32 = vector.shape_cast %29 : vector<5x32xf32> to vector<1x5x32xf32>
    tpu.vector_store %arg6[%c0_15, %c0_16, %c0_17], %32 {strides = array<i32>} : memref<1x5x32xf32, #tpu.memory_space<vmem>>, vector<1x5x32xf32>,
    return
  }
  func.func @transform_0(%arg0: i32) -> (i32, i32, i32) {
    %c0_i32 = arith.constant 0 : i32
    %c0_i32_0 = arith.constant 0 : i32
    %c0_i32_1 = arith.constant 0 : i32
    return %arg0, %c0_i32, %c0_i32_0 : i32, i32, i32
  }
  func.func @transform_1(%arg0: i32) -> (i32, i32) {
    %c0_i32 = arith.constant 0 : i32
    %c0_i32_0 = arith.constant 0 : i32
    %c0_i32_1 = arith.constant 0 : i32
    return %c0_i32, %c0_i32_0 : i32, i32
  }
  func.func @transform_2(%arg0: i32) -> (i32, i32) {
    %c0_i32 = arith.constant 0 : i32
    %c0_i32_0 = arith.constant 0 : i32
    %c0_i32_1 = arith.constant 0 : i32
    return %c0_i32, %c0_i32_0 : i32, i32
  }
  func.func @transform_3(%arg0: i32) -> (i32, i32) {
    %c0_i32 = arith.constant 0 : i32
    %c0_i32_0 = arith.constant 0 : i32
    %c0_i32_1 = arith.constant 0 : i32
    return %c0_i32, %c0_i32_0 : i32, i32
  }
  func.func @transform_4(%arg0: i32) -> (i32, i32) {
    %c0_i32 = arith.constant 0 : i32
    %c0_i32_0 = arith.constant 0 : i32
    %c0_i32_1 = arith.constant 0 : i32
    return %c0_i32, %c0_i32_0 : i32, i32
  }
  func.func @transform_5(%arg0: i32) -> (i32, i32, i32) {
    %c0_i32 = arith.constant 0 : i32
    %c0_i32_0 = arith.constant 0 : i32
    %c0_i32_1 = arith.constant 0 : i32
    return %arg0, %c0_i32, %c0_i32_0 : i32, i32, i32
  }
}

module attributes {stable_mosaic.version = 11 : i64} {
  func.func @_head_kernel(%arg0: memref<4x32xf32, #tpu.memory_space<vmem>>, %arg1: memref<1x32xf32, #tpu.memory_space<vmem>>, %arg2: memref<1x32xf32, #tpu.memory_space<vmem>>, %arg3: memref<32x16xbf16, #tpu.memory_space<vmem>>, %arg4: memref<16x5xbf16, #tpu.memory_space<vmem>>, %arg5: memref<1x5xf32, #tpu.memory_space<vmem>>, %arg6: memref<1x5xf32, #tpu.memory_space<vmem>>, %arg7: memref<1x5xf32, #tpu.memory_space<vmem>>, %arg8: memref<2x5xf32, #tpu.memory_space<vmem>>, %arg9: memref<2x16xf32, #tpu.memory_space<vmem>>) attributes {dimension_semantics = [], scalar_prefetch = 0 : i64, scratch_operands = 0 : i64, tpu.core_type = #tpu.core_type<tc>} {
    %c0 = arith.constant 0 : index
    %c0_0 = arith.constant 0 : index
    %0 = vector.load %arg0[%c0, %c0_0] : memref<4x32xf32, #tpu.memory_space<vmem>>, vector<4x32xf32>
    %c0_1 = arith.constant 0 : index
    %c0_2 = arith.constant 0 : index
    %1 = vector.load %arg1[%c0_1, %c0_2] : memref<1x32xf32, #tpu.memory_space<vmem>>, vector<1x32xf32>
    %c0_3 = arith.constant 0 : index
    %c0_4 = arith.constant 0 : index
    %2 = vector.load %arg2[%c0_3, %c0_4] : memref<1x32xf32, #tpu.memory_space<vmem>>, vector<1x32xf32>
    %cst = arith.constant dense<0.000000e+00> : vector<4xf32>
    %3 = vector.multi_reduction <add>, %0, %cst [1] : vector<4x32xf32> to vector<4xf32>
    %4 = vector.shape_cast %3 : vector<4xf32> to vector<4x1xf32>
    %cst_5 = arith.constant 3.200000e+01 : f32
    %5 = vector.broadcast %cst_5 : f32 to vector<4x1xf32>
    %6 = arith.divf %4, %5 : vector<4x1xf32>
    %7 = vector.broadcast %6 : vector<4x1xf32> to vector<4x32xf32>
    %8 = arith.subf %0, %7 : vector<4x32xf32>
    %9 = arith.mulf %8, %8 : vector<4x32xf32>
    %cst_6 = arith.constant dense<0.000000e+00> : vector<4xf32>
    %10 = vector.multi_reduction <add>, %9, %cst_6 [1] : vector<4x32xf32> to vector<4xf32>
    %11 = vector.shape_cast %10 : vector<4xf32> to vector<4x1xf32>
    %cst_7 = arith.constant 3.200000e+01 : f32
    %12 = vector.broadcast %cst_7 : f32 to vector<4x1xf32>
    %13 = arith.divf %11, %12 : vector<4x1xf32>
    %14 = vector.broadcast %6 : vector<4x1xf32> to vector<4x32xf32>
    %15 = arith.subf %0, %14 : vector<4x32xf32>
    %cst_8 = arith.constant 9.99999974E-6 : f32
    %16 = vector.broadcast %cst_8 : f32 to vector<4x1xf32>
    %17 = arith.addf %13, %16 : vector<4x1xf32>
    %18 = math.rsqrt %17 : vector<4x1xf32>
    %19 = vector.broadcast %18 : vector<4x1xf32> to vector<4x32xf32>
    %20 = arith.mulf %15, %19 : vector<4x32xf32>
    %21 = vector.broadcast %1 : vector<1x32xf32> to vector<4x32xf32>
    %22 = arith.mulf %20, %21 : vector<4x32xf32>
    %23 = vector.broadcast %2 : vector<1x32xf32> to vector<4x32xf32>
    %24 = arith.addf %22, %23 : vector<4x32xf32>
    %25 = arith.truncf %24 : vector<4x32xf32> to vector<4x32xbf16>
    %c0_9 = arith.constant 0 : index
    %c0_10 = arith.constant 0 : index
    %26 = vector.load %arg3[%c0_9, %c0_10] : memref<32x16xbf16, #tpu.memory_space<vmem>>, vector<32x16xbf16>
    %cst_11 = arith.constant dense<0.000000e+00> : vector<4x16xf32>
    %27 = tpu.matmul %25, %26, %cst_11 {dimension_numbers = #tpu.dot_dimension_numbers<[1], [0], [0], [1], [0, 0, 1, 1], [], []>} : vector<4x32xbf16>, vector<32x16xbf16>, vector<4x16xf32> -> vector<4x16xf32>
    %28 = vector.shape_cast %27 : vector<4x16xf32> to vector<2x2x16xf32>
    %cst_12 = arith.constant dense<0xFF800000> : vector<2x16xf32>
    %29 = vector.multi_reduction <maximumf>, %28, %cst_12 [1] : vector<2x2x16xf32> to vector<2x16xf32>
    %c0_13 = arith.constant 0 : index
    %c0_14 = arith.constant 0 : index
    %30 = vector.load %arg9[%c0_13, %c0_14] : memref<2x16xf32, #tpu.memory_space<vmem>>, vector<2x16xf32>
    tpu.vector_store %arg9[%c0_13, %c0_14], %29 {strides = array<i32>} : memref<2x16xf32, #tpu.memory_space<vmem>>, vector<2x16xf32>,
    %31 = arith.truncf %29 : vector<2x16xf32> to vector<2x16xbf16>
    %c0_15 = arith.constant 0 : index
    %c0_16 = arith.constant 0 : index
    %32 = vector.load %arg4[%c0_15, %c0_16] : memref<16x5xbf16, #tpu.memory_space<vmem>>, vector<16x5xbf16>
    %cst_17 = arith.constant dense<0.000000e+00> : vector<2x5xf32>
    %33 = tpu.matmul %31, %32, %cst_17 {dimension_numbers = #tpu.dot_dimension_numbers<[1], [0], [0], [1], [0, 0, 1, 1], [], []>} : vector<2x16xbf16>, vector<16x5xbf16>, vector<2x5xf32> -> vector<2x5xf32>
    %c0_18 = arith.constant 0 : index
    %c0_19 = arith.constant 0 : index
    %34 = vector.load %arg5[%c0_18, %c0_19] : memref<1x5xf32, #tpu.memory_space<vmem>>, vector<1x5xf32>
    %35 = vector.broadcast %34 : vector<1x5xf32> to vector<2x5xf32>
    %36 = arith.addf %33, %35 : vector<2x5xf32>
    %cst_20 = arith.constant dense<0.000000e+00> : vector<5xf32>
    %37 = vector.multi_reduction <add>, %36, %cst_20 [0] : vector<2x5xf32> to vector<5xf32>
    %38 = vector.shape_cast %37 : vector<5xf32> to vector<1x5xf32>
    %cst_21 = arith.constant 2.000000e+00 : f32
    %39 = vector.broadcast %cst_21 : f32 to vector<1x5xf32>
    %40 = arith.divf %38, %39 : vector<1x5xf32>
    %41 = vector.broadcast %40 : vector<1x5xf32> to vector<2x5xf32>
    %42 = arith.subf %36, %41 : vector<2x5xf32>
    %43 = arith.mulf %42, %42 : vector<2x5xf32>
    %cst_22 = arith.constant dense<0.000000e+00> : vector<5xf32>
    %44 = vector.multi_reduction <add>, %43, %cst_22 [0] : vector<2x5xf32> to vector<5xf32>
    %45 = vector.shape_cast %44 : vector<5xf32> to vector<1x5xf32>
    %cst_23 = arith.constant 2.000000e+00 : f32
    %46 = vector.broadcast %cst_23 : f32 to vector<1x5xf32>
    %47 = arith.divf %45, %46 : vector<1x5xf32>
    %48 = vector.broadcast %40 : vector<1x5xf32> to vector<2x5xf32>
    %49 = arith.subf %36, %48 : vector<2x5xf32>
    %cst_24 = arith.constant 9.99999974E-6 : f32
    %50 = vector.broadcast %cst_24 : f32 to vector<1x5xf32>
    %51 = arith.addf %47, %50 : vector<1x5xf32>
    %52 = math.rsqrt %51 : vector<1x5xf32>
    %53 = vector.broadcast %52 : vector<1x5xf32> to vector<2x5xf32>
    %54 = arith.mulf %49, %53 : vector<2x5xf32>
    %c0_25 = arith.constant 0 : index
    %c0_26 = arith.constant 0 : index
    %55 = vector.load %arg6[%c0_25, %c0_26] : memref<1x5xf32, #tpu.memory_space<vmem>>, vector<1x5xf32>
    %56 = vector.broadcast %55 : vector<1x5xf32> to vector<2x5xf32>
    %57 = arith.mulf %54, %56 : vector<2x5xf32>
    %c0_27 = arith.constant 0 : index
    %c0_28 = arith.constant 0 : index
    %58 = vector.load %arg7[%c0_27, %c0_28] : memref<1x5xf32, #tpu.memory_space<vmem>>, vector<1x5xf32>
    %59 = vector.broadcast %58 : vector<1x5xf32> to vector<2x5xf32>
    %60 = arith.addf %57, %59 : vector<2x5xf32>
    %c0_29 = arith.constant 0 : index
    %c0_30 = arith.constant 0 : index
    %61 = vector.load %arg8[%c0_29, %c0_30] : memref<2x5xf32, #tpu.memory_space<vmem>>, vector<2x5xf32>
    tpu.vector_store %arg8[%c0_29, %c0_30], %60 {strides = array<i32>} : memref<2x5xf32, #tpu.memory_space<vmem>>, vector<2x5xf32>,
    return
  }
}

</mosaic_0001>

<bundles_post_ra>
// kernel: _lambda_.4
= control target key start
LH: loop header
LB: loop body
LE: loop exit
PB: predicated region body
PF: predicated region fallthrough
CT: control target
= control target key end

     0   :  { %s549_s18 = smov 0   ;;  %s621_s0 = inlined_call_operand.vmem [shape: bf16[4,5,192], index: 0, kind: input, shape index: {}]   ;;  %s622_s1 = inlined_call_operand.vmem [shape: bf16[192,32], index: 1, kind: input, shape index: {}]   ;;  %s623_s2 = inlined_call_operand.vmem [shape: f32[5,32], index: 2, kind: input, shape index: {}]   ;;  %s624_s3 = inlined_call_operand.vmem [shape: f32[1,32], index: 3, kind: input, shape index: {}]   ;;  %s625_s4 = inlined_call_operand.vmem [shape: f32[1,32], index: 4, kind: input, shape index: {}]   ;;  %s626_s5 = inlined_call_operand.vmem [shape: f32[4,5,32], index: 5, kind: output, shape index: {}]  }
   0x1 LB: > { %s457_s19 = sadd.s32 4294967295, %s516_s18   ;;  %p461_p0 = scmp.ge.s32.totalorder %s516_s18, 1  ;;  %s516_s18 = sphi %s549_s18, %s15_s18  }
   0x2   : > { %p187_p1 = scmp.lt.s32.totalorder %s516_s18, 5 }
   0x4   : > { %p188_p2 = pnand %p461_p0, %p187_p1 }
   0x5   : > { %v494_v0 = vld [vmem:[%s622_s1] sm:$0xff] (!%p188_p2)   ;;  %v518_v1 = vmov (!%p188_p2), 0   ;;  %p214_p3 = scmp.lt.s32.totalorder (!%p188_p2), %s457_s19, 3  ;;  %v495_v2 = vld [vmem:[%s622_s1 + $0x8] sm:$0xff] (!%p188_p2)   ;;  %v496_v3 = vld [vmem:[%s622_s1 + $0x10] sm:$0xff] (!%p188_p2)   ;;  %vm328_vm0 = vcmask (!%p188_p2), 523264  }
   0x6   : > { %191 = sbr.rel (%p188_p2) target bundleno = 582 (0x246), region = 40  ;;  %332 = vmatprep.subr.bf16.mxu0 (!%p188_p2), %v518_v1  ;;  %v497_v4 = vld [vmem:[%s622_s1 + $0x18] sm:$0xff] (!%p188_p2)   ;;  %v498_v7 = vld [vmem:[%s622_s1 + $0x20] sm:$0xff] (!%p188_p2)   ;;  %v499_v8 = vld [vmem:[%s622_s1 + $0x28] sm:$0xff] (!%p188_p2)   ;;  %vm374_vm1 = vcmask (!%p188_p2), 258048  }
   0x7   : > { %333 = vmatpush1.bf16.msra.mxu0 (!%p188_p2), %v494_v0  ;;  %v500_v9 = vld [vmem:[%s622_s1 + $0x30] sm:$0xff] (!%p188_p2)   ;;  %v501_v10 = vld [vmem:[%s622_s1 + $0x38] sm:$0xff] (!%p188_p2)   ;;  %v502_v11 = vld [vmem:[%s622_s1 + $0x40] sm:$0xff] (!%p188_p2)  }
   0x8   : > { %334 = vmatprep.subr.bf16.mxu0 (!%p188_p2), %v518_v1  ;;  %v503_v12 = vld [vmem:[%s622_s1 + $0x48] sm:$0xff] (!%p188_p2)   ;;  %v504_v13 = vld [vmem:[%s622_s1 + $0x50] sm:$0xff] (!%p188_p2)   ;;  %v505_v14 = vld [vmem:[%s622_s1 + $0x58] sm:$0xff] (!%p188_p2)  }
   0x9   : > { %v249_v16 = vld [vmem:[%s623_s2] sm:$0x1f] (!%p188_p2) }
   0xa   : > { %v480_v32 = vld [vmem:[%s624_s3] ss:$0 sm:$0xff] (!%p188_p2) }
   0xb   : > { %335 = vmatpush1.bf16.msra.mxu0 (!%p188_p2), %v495_v2  ;;  %v481_v34 = vld [vmem:[%s625_s4] ss:$0 sm:$0xff] (!%p188_p2) }
   0xc   : > { %336 = vmatprep.subr.bf16.mxu0 (!%p188_p2), %v518_v1 }
   0xd   : > { %s628_s19 = smov (!%p214_p3, %s457_s19), 3 }
   0xe   : > { %s484_s26 = sshll.u32 %s628_s19, 3 }
   0xf   : > { %s218_s29 = scalar_lea.vmem %s621_s0, %s484_s26  ;;  %337 = vmatpush1.bf16.msra.mxu0 %v496_v3  ;;  %s222_s9 = scalar_lea.vmem %s626_s5, %s484_s26 }
  0x10   : > { %338 = vmatprep.subr.bf16.mxu0 %v518_v1  ;;  %v224_v5 = vld [vmem:[%s218_s29] sm:$0x77] }
  0x11   : > { %v466_v6 = vcombine.high %v224_v5, %v224_v5  ;;  %v465_v15 = vcombine.low %v224_v5, %v224_v5 }
  0x13   : > { %339 = vmatpush1.bf16.msra.mxu0 %v497_v4  ;;  %479 = vmatprep.mubr.msk.bf16.mxu0 %vm328_vm0, %v466_v6 }
  0x14   : > { %340 = vmatprep.subr.bf16.mxu0 %v518_v1 }
  0x17   : > { %341 = vmatpush1.bf16.msra.mxu0 %v498_v7 }
  0x18   : > { %342 = vmatprep.subr.bf16.mxu0 %v518_v1 }
  0x1b   : > { %343 = vmatpush1.bf16.msra.mxu0 %v499_v8 }
  0x1c   : > { %344 = vmatprep.subr.bf16.mxu0 %v518_v1 }
  0x1f   : > { %345 = vmatpush1.bf16.msra.mxu0 %v500_v9 }
  0x20   : > { %346 = vmatprep.subr.bf16.mxu0 %v518_v1 }
  0x23   : > { %347 = vmatpush1.bf16.msra.mxu0 %v501_v10 }
  0x24   : > { %348 = vmatprep.subr.bf16.mxu0 %v518_v1 }
  0x27   : > { %349 = vmatpush1.bf16.msra.mxu0 %v502_v11 }
  0x28   : > { %350 = vmatprep.subr.bf16.mxu0 %v518_v1 }
  0x2b   : > { %351 = vmatpush1.bf16.msra.mxu0 %v503_v12 }
  0x2c   : > { %352 = vmatprep.subr.bf16.mxu0 %v518_v1 }
  0x2f   : > { %353 = vmatpush1.bf16.msra.mxu0 %v504_v13 }
  0x30   : > { %354 = vmatprep.subr.bf16.mxu0 %v518_v1 }
  0x33   : > { %355 = vmatpush1.bf16.msra.mxu0 %v505_v14 }
  0x36   : > { %365 = vmatmul.mubr.bf16.vlgmr.msra.gmra.mrb[0].mxu0 %v465_v15 }
 0x109   : > { %v366_v17 = vpop.f32.mrb[0].mxu0 }
 0x10a   : > { %v367_v18 = vadd.f32 %v366_v17, %v249_v16  ;;  %v368_v19 = vpop.f32.mrb[1].mxu0 }
 0x10b   : > { %v369_v20 = vpop.f32.mrb[2].mxu0 }
 0x10c   : > { %v370_v21 = vpop.f32.mrb[3].mxu0  ;;  %v375_v22 = vsel %vm374_vm1, %v367_v18, 0.0 }
 0x10d   : > { %376 = vadd.xlane.f32.xlu0 %v375_v22 }
 0x19a   : > { %v377_v23 = vpop.xlane.xlu0 %376 }
 0x19b   : > { %v379_v24 = vmul.f32 0.03125, %v377_v23 }
 0x19d   : > { %v380_v25 = vsub.f32 %v367_v18, %v379_v24 }
 0x19f   : > { %v381_v26 = vmul.f32 %v380_v25, %v380_v25 }
 0x1a1   : > { %v382_v27 = vsel %vm374_vm1, %v381_v26, 0.0 }
 0x1a2   : > { %383 = vadd.xlane.f32.xlu0 %v382_v27 }
 0x22f   : > { %v384_v28 = vpop.xlane.xlu0 %383 }
 0x230   : > { %v385_v29 = vmul.f32 0.03125, %v384_v28 }
 0x232   : > { %v386_v30 = vadd.f32 1e-05, %v385_v29 }
 0x234   : > { %508 = vrsqrt.f32 %v386_v30 }
 0x23e   : > { %v509_v31 = vpop.eup %508 }
 0x23f   : > { %v388_v33 = vmul.f32 %v509_v31, %v380_v25 }
 0x241   : > { %v395_v35 = vmul.f32 %v480_v32, %v388_v33 }
 0x243   : > { %v402_v36 = vadd.f32 %v481_v34, %v395_v35 }
 0x245   : > { %403 = vst.msk [vmem:[%s222_s9] sm:$0x1f] %vm374_vm1, %v402_v36 }
 0x246 PF: > { %s15_s18 = sadd.s32 1, %s516_s18  }
 0x247   : > { %p12_p4 = scmp.ge.s32.totalorder %s15_s18, 6  }
 0x249   :  { %14 = sbr.rel (!%p12_p4) target bundleno = 1 (0x1), region = 70 }

// kernel: _lambda_.7
= control target key start
LH: loop header
LB: loop body
LE: loop exit
PB: predicated region body
PF: predicated region fallthrough
CT: control target
= control target key end

     0   :  { %15 = vsyncpa [#allocation3], 0  ;;  %vm37_vm0 = vcmask 257024   ;;  %s495_s0 = inlined_call_operand.vmem [shape: f32[4,32], index: 0, kind: input, shape index: {}]   ;;  %s496_s1 = inlined_call_operand.vmem [shape: f32[1,32], index: 1, kind: input, shape index: {}]   ;;  %s497_s2 = inlined_call_operand.vmem [shape: f32[1,32], index: 2, kind: input, shape index: {}]   ;;  %s498_s3 = inlined_call_operand.vmem [shape: bf16[32,16], index: 3, kind: input, shape index: {}]   ;;  %s499_s4 = inlined_call_operand.vmem [shape: bf16[16,5], index: 4, kind: input, shape index: {}]   ;;  %s500_s5 = inlined_call_operand.vmem [shape: f32[1,5], index: 5, kind: input, shape index: {}, may-alias: {5,7}]   ;;  %s501_s6 = inlined_call_operand.vmem [shape: f32[1,5], index: 6, kind: input, shape index: {}]   ;;  %s502_s7 = inlined_call_operand.vmem [shape: f32[1,5], index: 7, kind: input, shape index: {}, may-alias: {5,7}]   ;;  %s503_s8 = inlined_call_operand.hbm [shape: f32[2,5], index: 8, kind: output, shape index: {0}]   ;;  %s504_s9 = inlined_call_operand.hbm [shape: f32[2,16], index: 9, kind: output, shape index: {1}]  }
   0x1   :  { %v34_v0 = vld [vmem:[%s495_s0] sm:$0xf] }
   0x2   :  { %v38_v1 = vsel %vm37_vm0, %v34_v0, 0.0 }
   0x3   :  { %39 = vadd.xlane.f32.xlu0 %v38_v1 }
   0x4   :  { %16 = vsyncpa [#allocation5], 0  ;;  %v328_v7 = vld [vmem:[%s498_s3] sm:$0xff]   ;;  %v383_v8 = vmov 0.0   ;;  %v329_v9 = vld [vmem:[%s498_s3 + $0x8] sm:$0xff]   ;;  %vm384_vm1 = vmmov 0   ;;  %v131_v23 = vlaneseq }
   0x5   :  { %309 = vmatprep.subr.bf16.mxu0 %v383_v8  ;;  %317 = vmatprep.subr.bf16.mxu1 %v383_v8  ;;  %v294_v14 = vld [vmem:[%s496_s1] ss:$0 sm:$0xff]  ;;  %vm83_vm2 = vcmask 261120   ;;  %v385_v21 = vmov 1983009808   ;;  %vm138_vm3 = vcmask 123904  }
   0x6   :  { %310 = vmatpush3.bf16.msra.mxu0 %v328_v7  ;;  %313 = vmatprep.mubr.msk.bf16.mxu0 %vm384_vm1, %v383_v8  ;;  %v295_v16 = vld [vmem:[%s497_s2] ss:$0 sm:$0xff]  ;;  %v129_v22 = vunpack.c.l.s4 %v385_v21  ;;  %v132_v25 = vshrl.u32 %v131_v23, 7  ;;  %vm155_vm4 = vcmask 1041409   ;;  %vm182_vm5 = vcmask 130048   ;;  %s386_s1 = smov [#allocation4]  }
   0x7   :  { %311 = vmatprep.subr.bf16.mxu0 %v383_v8  ;;  %319 = vmatprep.mubr.msk.bf16.mxu1 %vm384_vm1, %v383_v8  ;;  %v330_v20 = vld [vmem:[%s499_s4] sm:$0xff]   ;;  %s282_s2 = sshll.u32 %s386_s1, 4  ;;  %s283_s2 = int_to_ptr.vmem [resolvable:$true] %s282_s2 }
   0x8   :  { %318 = vmatpush3.bf16.msra.mxu1 %v330_v20  ;;  %v130_v24 = vunpack.c.0.s8 %v129_v22  ;;  %s335_s4 = scalar_lea.vmem %s283_s2, 32  ;;  %p340_p1 = scmp.lt.s32.totalorder %s283_s2, %s283_s2 }
   0x9   :  { %p336_p0 = scmp.ne.s32.totalorder %s283_s2, %s335_s4  ;;  %p341_p2 = scmp.lt.s32.totalorder %s335_s4, %s335_s4 }
   0xa   :  { %312 = vmatpush3.bf16.msra.mxu0 %v329_v9  ;;  %v133_v26 = vsub.s32 %v130_v24, %v132_v25 }
   0xb   :  { %p342_p3 = por %p341_p2, %p340_p1 }
   0xd   :  { %p343_p4 = pnand %p342_p3, %p336_p0 }
  0x90   :  { %v40_v2 = vpop.xlane.xlu0 %39 }
  0x91   :  { %v42_v3 = vmul.f32 0.03125, %v40_v2 }
  0x93   :  { %v43_v4 = vsub.f32 %v34_v0, %v42_v3 }
  0x95   :  { %v44_v5 = vmul.f32 %v43_v4, %v43_v4 }
  0x97   :  { %v45_v6 = vsel %vm37_vm0, %v44_v5, 0.0 }
  0x98   :  { %46 = vadd.xlane.f32.xlu0 %v45_v6 }
 0x125   :  { %v47_v10 = vpop.xlane.xlu0 %46 }
 0x126   :  { %v48_v11 = vmul.f32 0.03125, %v47_v10 }
 0x128   :  { %v49_v12 = vadd.f32 1e-05, %v48_v11 }
 0x12a   :  { %331 = vrsqrt.f32 %v49_v12 }
 0x134   :  { %v332_v13 = vpop.eup %331 }
 0x135   :  { %v51_v15 = vmul.f32 %v332_v13, %v43_v4 }
 0x137   :  { %v58_v17 = vmul.f32 %v294_v14, %v51_v15 }
 0x139   :  { %v65_v18 = vadd.f32 %v295_v16, %v58_v17 }
 0x13b   :  { %v66_v19 = vpack.c.bf16 %v65_v18, %v65_v18 }
 0x13d   :  { %314 = vmatmul.mubr.msk.bf16.vlgmr.msra.gmra.mrb[0].mxu0 %vm83_vm2, %v66_v19 }
 0x210   :  { %v121_v27 = vpop.f32.mrb[0].mxu0 }
 0x211   :  { %v134_v28 = vrot.slane %v121_v27, %v133_v26  ;;  %v315_v29 = vpop.f32.mrb[1].mxu0 }
 0x212   :  { %v124_v30 = vpop.f32.mrb[2].mxu0 }
 0x213   :  { %v135_v31 = vcombine.high %v134_v28, %v134_v28  ;;  %v139_v32 = vsel %vm138_vm3, %v134_v28, -inf  ;;  %v316_v33 = vpop.f32.mrb[3].mxu0 }
 0x214   :  { %v140_v34 = vrot.slane %v139_v32, 4 }
 0x215   :  { %v146_v35 = vsel %vm138_vm3, %v135_v31, -inf }
 0x216   :  { %v141_v36 = vmax.f32 %v139_v32, %v140_v34  ;;  %v147_v37 = vrot.slane %v146_v35, 4 }
 0x218   :  { %v142_v38 = vrot.slane %v141_v36, 2  ;;  %v148_v39 = vmax.f32 %v146_v35, %v147_v37 }
 0x21a   :  { %v143_v40 = vmax.f32 %v141_v36, %v142_v38  ;;  %v149_v41 = vrot.slane %v148_v39, 2 }
 0x21c   :  { %v144_v42 = vrot.slane %v143_v40, 1  ;;  %v150_v43 = vmax.f32 %v148_v39, %v149_v41 }
 0x21e   :  { %v145_v44 = vmax.f32 %v143_v40, %v144_v42  ;;  %v151_v45 = vrot.slane %v150_v43, 1 }
 0x220   :  { %v152_v46 = vmax.f32 %v150_v43, %v151_v45  ;;  %v159_v47 = vpack.c.bf16 %v145_v44, %v145_v44 }
 0x222   :  { %v160_v48 = vpack.c.bf16 %v152_v46, %v152_v46  ;;  %v156_v49 = vsel %vm155_vm4, %v152_v46, %v145_v44  ;;  %v172_v50 = vunpack.c.l.b16 %v159_v47 }
 0x223   :  { %158 = vst.msk [vmem:[#allocation4] sm:$0x3] %vm138_vm3, %v156_v49 }
 0x224   :  { %v173_v51 = vunpack.c.l.b16 %v160_v48 }
 0x226   :  { %v174_v52 = vsel %vm155_vm4, %v173_v51, %v172_v50 }
 0x227   :  { %v175_v53 = vpack.c.b16 %v174_v52, %v174_v52 }
 0x229   :  { %320 = vmatmul.mubr.msk.bf16.vlgmr.msra.gmra.mrb[0].mxu1 %vm182_vm5, %v175_v53 }
 0x22a   :  { %346 = shalt.err (!%p343_p4)
}
 0x22b   :  { %s347_s21 = scalar_lea.hbm %s504_s9, 32 }
 0x22c   :  { %p348_p5 = scmp.ne.s32.totalorder %s504_s9, %s347_s21  ;;  %p351_p6 = scmp.lt.u32.totalorder %s347_s21, %s504_s9 }
 0x22e   :  { %p353_p7 = pnand %p351_p6, %p348_p5 }
 0x230   :  { %356 = shalt.err (!%p353_p7)
}
 0x231   :  { %285 = dma.vmem_to_hbm [thread:$0]  %s283_s2, 32, %s504_s9, [#allocation5]   ;;  %v299_v54 = vld [vmem:[%s500_s5] ss:$0 sm:$0xff]  ;;  %vm226_vm6 = vcmask 33792  }
 0x232   :  { %v302_v16 = vld [vmem:[%s501_s6] ss:$0 sm:$0xff]  ;;  %s387_s11 = smov [#allocation2]  }
 0x233   :  { %v303_v18 = vld [vmem:[%s502_s7] ss:$0 sm:$0xff]  ;;  %s272_s12 = sshll.u32 %s387_s11, 4  ;;  %s273_s12 = int_to_ptr.vmem [resolvable:$true] %s272_s12 }
 0x234   :  { %s357_s13 = scalar_lea.vmem %s273_s12, 32  ;;  %p362_p9 = scmp.lt.s32.totalorder %s273_s12, %s273_s12 }
 0x235   :  { %p358_p8 = scmp.ne.s32.totalorder %s273_s12, %s357_s13  ;;  %p363_p10 = scmp.lt.s32.totalorder %s357_s13, %s357_s13 }
 0x237   :  { %p364_p11 = por %p363_p10, %p362_p9 }
 0x239   :  { %p365_p12 = pnand %p364_p11, %p358_p8 }
 0x2fc   :  { %v220_v55 = vpop.f32.mrb[0].mxu1 }
 0x2fd   :  { %v221_v56 = vadd.f32 %v299_v54, %v220_v55  ;;  %v321_v57 = vpop.f32.mrb[1].mxu1 }
 0x2fe   :  { %v223_v58 = vpop.f32.mrb[2].mxu1 }
 0x2ff   :  { %v227_v59 = vsel %vm226_vm6, %v221_v56, 0.0  ;;  %v322_v60 = vpop.f32.mrb[3].mxu1 }
 0x300   :  { %v228_v61 = vrot.slane %v227_v59, 4 }
 0x302   :  { %v229_v62 = vadd.f32 %v228_v61, %v227_v59 }
 0x304   :  { %v230_v63 = vrot.slane %v229_v62, 2 }
 0x306   :  { %v231_v0 = vadd.f32 %v230_v63, %v229_v62 }
 0x308   :  { %v232_v1 = vrot.slane %v231_v0, 1 }
 0x30a   :  { %v233_v2 = vadd.f32 %v232_v1, %v231_v0 }
 0x30c   :  { %v235_v3 = vmul.f32 0.5, %v233_v2 }
 0x30e   :  { %v236_v4 = vsub.f32 %v221_v56, %v235_v3 }
 0x310   :  { %v237_v5 = vmul.f32 %v236_v4, %v236_v4 }
 0x312   :  { %v238_v6 = vsel %vm226_vm6, %v237_v5, 0.0 }
 0x313   :  { %v239_v7 = vrot.slane %v238_v6, 4 }
 0x315   :  { %v240_v8 = vadd.f32 %v239_v7, %v238_v6 }
 0x317   :  { %v241_v9 = vrot.slane %v240_v8, 2 }
 0x319   :  { %v242_v10 = vadd.f32 %v241_v9, %v240_v8 }
 0x31b   :  { %v243_v11 = vrot.slane %v242_v10, 1 }
 0x31d   :  { %v244_v12 = vadd.f32 %v243_v11, %v242_v10 }
 0x31f   :  { %v245_v13 = vmul.f32 0.5, %v244_v12 }
 0x321   :  { %v246_v14 = vadd.f32 1e-05, %v245_v13 }
 0x323   :  { %333 = vrsqrt.f32 %v246_v14 }
 0x32d   :  { %v334_v15 = vpop.eup %333 }
 0x32e   :  { %v248_v17 = vmul.f32 %v334_v15, %v236_v4 }
 0x330   :  { %v256_v19 = vmul.f32 %v302_v16, %v248_v17 }
 0x332   :  { %v264_v20 = vadd.f32 %v303_v18, %v256_v19 }
 0x334   :  { %265 = vst.msk [vmem:[#allocation2] sm:$0x3] %vm226_vm6, %v264_v20 }
 0x335   :  { %368 = shalt.err (!%p365_p12)
}
 0x336   :  { %s369_s14 = scalar_lea.hbm %s503_s8, 32 }
 0x337   :  { %p370_p13 = scmp.ne.s32.totalorder %s503_s8, %s369_s14  ;;  %p373_p0 = scmp.lt.u32.totalorder %s369_s14, %s503_s8 }
 0x339   :  { %p375_p1 = pnand %p373_p0, %p370_p13 }
 0x33b   :  { %378 = shalt.err (!%p375_p1)
}
 0x33c   :  { %275 = dma.vmem_to_hbm [thread:$0]  %s273_s12, 32, %s503_s8, [#allocation3]  }
 0x33d   :  { %379 = dma.done.wait [#allocation3], 32  }
 0x33e   :  { %380 = vsyncadd [#allocation3], 4294967264 }
 0x33f   :  { %381 = dma.done.wait [#allocation5], 32  }
 0x340   :  { %382 = vsyncadd [#allocation5], 4294967264 }
 0x341   :  { %292 = vsyncpa [#allocation3], 1 }
 0x342   :  { %293 = vsyncpa [#allocation5], 1 }

// kernel: _lambda_.5
= control target key start
LH: loop header
LB: loop body
LE: loop exit
PB: predicated region body
PF: predicated region fallthrough
CT: control target
= control target key end

     0   :  { %s1669_s25 = smov 0   ;;  %s1858_s0 = inlined_call_operand.vmem [shape: f32[4,5,32], index: 0, kind: input, shape index: {}]   ;;  %s1859_s1 = inlined_call_operand.vmem [shape: f32[1,32], index: 1, kind: input, shape index: {}, may-alias: {1,7}]   ;;  %s1860_s2 = inlined_call_operand.vmem [shape: f32[1,32], index: 2, kind: input, shape index: {}, may-alias: {2,6,8,12}]   ;;  %s1861_s3 = inlined_call_operand.vmem [shape: bf16[32,96], index: 3, kind: input, shape index: {}]   ;;  %s1862_s4 = inlined_call_operand.vmem [shape: f32[1,96], index: 4, kind: input, shape index: {}]   ;;  %s1863_s5 = inlined_call_operand.vmem [shape: bf16[32,32], index: 5, kind: input, shape index: {}]   ;;  %s1864_s6 = inlined_call_operand.vmem [shape: f32[1,32], index: 6, kind: input, shape index: {}, may-alias: {2,6,8,12}]   ;;  %s1865_s7 = inlined_call_operand.vmem [shape: f32[1,32], index: 7, kind: input, shape index: {}, may-alias: {1,7}]   ;;  %s1866_s8 = inlined_call_operand.vmem [shape: f32[1,32], index: 8, kind: input, shape index: {}, may-alias: {2,6,8,12}]   ;;  %s1867_s9 = inlined_call_operand.vmem [shape: bf16[32,128], index: 9, kind: input, shape index: {}]   ;;  %s1868_s10 = inlined_call_operand.vmem [shape: f32[1,128], index: 10, kind: input, shape index: {}]   ;;  %s1869_s11 = inlined_call_operand.vmem [shape: bf16[128,32], index: 11, kind: input, shape index: {}]   ;;  %s1870_s12 = inlined_call_operand.vmem [shape: f32[1,32], index: 12, kind: input, shape index: {}, may-alias: {2,6,8,12}]   ;;  %s1871_s13 = inlined_call_operand.vmem [shape: f32[4,5,32], index: 13, kind: output, shape index: {}]  }
   0x1 LB: > { %s1342_s26 = sadd.s32 4294967295, %s1580_s25   ;;  %p1346_p0 = scmp.ge.s32.totalorder %s1580_s25, 1  ;;  %s1580_s25 = sphi %s1669_s25, %s23_s25  }
   0x2   : > { %p386_p1 = scmp.lt.s32.totalorder %s1580_s25, 5 }
   0x4   : > { %p387_p2 = pnand %p1346_p0, %p386_p1 }
   0x5   : > { %p428_p3 = scmp.lt.s32.totalorder (!%p387_p2), %s1342_s26, 3  ;;  %vm440_vm0 = vcmask (!%p387_p2), 258048   ;;  %v1536_v7 = vld [vmem:[%s1861_s3] sm:$0xff] (!%p387_p2)   ;;  %v1582_v8 = vmov (!%p387_p2), 0.0   ;;  %vm1583_vm1 = vmmov (!%p387_p2), 0   ;;  %v1537_v9 = vld [vmem:[%s1861_s3 + $0x8] sm:$0xff] (!%p387_p2)  }
   0x6   : > { %390 = sbr.rel (%p387_p2) target bundleno = 2584 (0xa18), region = 72  ;;  %1419 = vmatprep.subr.bf16.mxu0 (!%p387_p2), %v1582_v8  ;;  %1423 = vmatprep.mubr.msk.bf16.mxu0 (!%p387_p2), %vm1583_vm1, %v1582_v8  ;;  %v1349_v14 = vld [vmem:[%s1859_s1] ss:$0 sm:$0xff] (!%p387_p2)  ;;  %vm493_vm2 = vcmask (!%p387_p2), 261120   ;;  %s1584_s24 = smov (!%p387_p2), 120   ;;  %vm541_vm3 = vcmask (!%p387_p2), 64512  }
   0x7   : > { %1420 = vmatpush3.bf16.msra.mxu0 (!%p387_p2), %v1536_v7  ;;  %1439 = vmatprep.subr.bf16.mxu1 (!%p387_p2), %v1582_v8  ;;  %v1350_v16 = vld [vmem:[%s1860_s2] ss:$0 sm:$0xff] (!%p387_p2)  ;;  %s1585_s28 = smov (!%p387_p2), 96   ;;  %s1586_s29 = smov (!%p387_p2), 88   ;;  %vm588_vm4 = vcmask (!%p387_p2), 36864   ;;  %vm607_vm5 = vcmask (!%p387_p2), 1041408  }
   0x8   : > { %1421 = vmatprep.subr.bf16.mxu0 (!%p387_p2), %v1582_v8  ;;  %1441 = vmatprep.mubr.msk.bf16.mxu1 (!%p387_p2), %vm1583_vm1, %v1582_v8  ;;  %v1351_v20 = vld [vmem:[%s1862_s4] ss:$0 sm:$0xff] (!%p387_p2)  ;;  %s1588_s14 = smov (!%p387_p2), 112   ;;  %s1589_s15 = smov (!%p387_p2), 72   ;;  %vm608_vm6 = vcmask (!%p387_p2), 1042432   ;;  %vm603_vm7 = vcmask (!%p387_p2), 39936  }
   0x9   : > { %s1590_s16 = smov (!%p387_p2), 104   ;;  %s1591_s17 = smov (!%p387_p2), 56   ;;  %vm997_vm8 = vcmask (!%p387_p2), 130048   ;;  %vm999_vm9 = vcmask (!%p387_p2), 195584  }
   0xa   : > { %s1592_s18 = smov (!%p387_p2), 64   ;;  %s1593_s19 = smov (!%p387_p2), 48  }
   0xb   : > { %1422 = vmatpush3.bf16.msra.mxu0 (!%p387_p2), %v1537_v9  ;;  %s1594_s20 = smov (!%p387_p2), 40   ;;  %s1596_s21 = smov (!%p387_p2), 8  }
   0xc   : > { %1427 = vmatprep.subr.bf16.mxu0 (!%p387_p2), %v1582_v8 }
   0xd   : > { %s1873_s26 = smov (!%p428_p3, %s1342_s26), 3 }
   0xe   : > { %s1347_s27 = sshll.u32 %s1873_s26, 3 }
   0xf   : > { %s431_s30 = scalar_lea.vmem %s1858_s0, %s1347_s27 }
  0x10   : > { %v1685_v0 = vld [vmem:[%s431_s30] sm:$0x1f]  ;;  %s1587_s30 = smov 80  }
  0x11   : > { %v441_v1 = vsel %vm440_vm0, %v1685_v0, 0.0 }
  0x12   : > { %442 = vadd.xlane.f32.xlu0 %v441_v1 }
  0x9f   : > { %v443_v2 = vpop.xlane.xlu0 %442 }
  0xa0   : > { %v445_v3 = vmul.f32 0.03125, %v443_v2 }
  0xa2   : > { %v446_v4 = vsub.f32 %v1685_v0, %v445_v3 }
  0xa4   : > { %v447_v5 = vmul.f32 %v446_v4, %v446_v4 }
  0xa6   : > { %v448_v6 = vsel %vm440_vm0, %v447_v5, 0.0 }
  0xa7   : > { %449 = vadd.xlane.f32.xlu0 %v448_v6 }
 0x134   : > { %v450_v10 = vpop.xlane.xlu0 %449 }
 0x135   : > { %v451_v11 = vmul.f32 0.03125, %v450_v10 }
 0x137   : > { %v452_v12 = vadd.f32 1e-05, %v451_v11 }
 0x139   : > { %1550 = vrsqrt.f32 %v452_v12 }
 0x143   : > { %v1551_v13 = vpop.eup %1550 }
 0x144   : > { %v454_v15 = vmul.f32 %v1551_v13, %v446_v4 }
 0x146   : > { %v461_v17 = vmul.f32 %v1349_v14, %v454_v15 }
 0x148   : > { %v468_v18 = vadd.f32 %v1350_v16, %v461_v17 }
 0x14a   : > { %v469_v19 = vpack.c.bf16 %v468_v18, %v468_v18  ;;  %v1595_v18 = vmov 65535  }
 0x14c   : > { %1424 = vmatmul.mubr.msk.bf16.vlgmr.msra.gmra.mrb[0].mxu0 %vm493_vm2, %v469_v19  ;;  %v609_v19 = vsel %vm607_vm5, 4294967295, %v1595_v18 }
 0x14d   : > { %1429 = vmatprep.mubr.msk.bf16.mxu0 %vm1583_vm1, %v1582_v8 }
 0x21f   : > { %v531_v21 = vpop.f32.mrb[0].mxu0 }
 0x220   : > { %v532_v22 = vadd.f32 %v1351_v20, %v531_v21  ;;  %v1425_v23 = vpop.f32.mrb[1].mxu0  ;;  %v610_v20 = vsel %vm608_vm6, %v609_v19, 0  ;;  %v1541_v19 = vld [vmem:[%s1867_s9 + $0x8] sm:$0xff]  }
 0x221   : > { %v534_v24 = vpop.f32.mrb[2].mxu0 }
 0x222   : > { %v1717_v25 = vpack.c.bf16 %v532_v22, %v532_v22  ;;  %v1426_v26 = vpop.f32.mrb[3].mxu0 }
 0x224   : > { %654 = vrot.lane.b32.xlu0 %v1717_v25, %s1584_s24  ;;  %539 = vrot.lane.b32.xlu1 %v1717_v25, %s1585_s28 }
 0x228   : > { %656 = vrot.lane.b32.xlu1 %v1717_v25, %s1586_s29  ;;  %s1597_s29 = smov 16  }
 0x22c   : > { %766 = vrot.lane.b32.xlu1 %v1717_v25, %s1587_s30  ;;  %s1598_s30 = smov 24  }
 0x230   : > { %764 = vrot.lane.b32.xlu1 %v1717_v25, %s1588_s14 }
 0x234   : > { %876 = vrot.lane.b32.xlu1 %v1717_v25, %s1589_s15 }
 0x238   : > { %874 = vrot.lane.b32.xlu1 %v1717_v25, %s1590_s16 }
 0x296   : > { %v540_v27 = vpop.permute.xlu1 %539  ;;  %v655_v32 = vpop.permute.xlu0 %654 }
 0x297   : > { %v546_v28 = vsel %vm541_vm3, %v540_v27, 0 }
 0x298   : > { %1428 = vmatpush3.bf16.xpose.msra.mxu0 %v546_v28 }
 0x299   : > { %1433 = vmatprep.subr.bf16.mxu0 %v1582_v8 }
 0x29a   : > { %v657_v29 = vpop.permute.xlu1 %656 }
 0x29b   : > { %v662_v30 = vsel %vm541_vm3, %v657_v29, 0 }
 0x29c   : > { %1440 = vmatpush3.bf16.xpose.msra.mxu1 %v662_v30 }
 0x29d   : > { %1451 = vmatprep.subr.bf16.mxu1 %v1582_v8 }
 0x29e   : > { %v767_v31 = vpop.permute.xlu1 %766 }
 0x29f   : > { %1430 = vmatmul.mubr.msk.bf16.vlgmr.msra.gmra.mrb[4].mxu0 %vm541_vm3, %v1717_v25  ;;  %v772_v34 = vsel %vm541_vm3, %v767_v31, 0 }
 0x2a0   : > { %1435 = vmatprep.mubr.msk.bf16.mxu0 %vm1583_vm1, %v1582_v8 }
 0x2a2   : > { %v765_v33 = vpop.permute.xlu1 %764 }
 0x2a3   : > { %1442 = vmatmul.mubr.msk.bf16.vlgmr.msra.gmra.mrb[0].mxu1 %vm541_vm3, %v655_v32 }
 0x2a4   : > { %1452 = vmatpush3.bf16.xpose.msra.mxu1 %v772_v34  ;;  %1453 = vmatprep.mubr.msk.bf16.mxu1 %vm1583_vm1, %v1582_v8 }
 0x2a5   : > { %1463 = vmatprep.subr.bf16.mxu1 %v1582_v8 }
 0x2a6   : > { %v877_v35 = vpop.permute.xlu1 %876 }
 0x2a7   : > { %v882_v36 = vsel %vm541_vm3, %v877_v35, 0 }
 0x2aa   : > { %v875_v37 = vpop.permute.xlu1 %874 }
 0x2ab   : > { %1454 = vmatmul.mubr.msk.bf16.vlgmr.msra.gmra.mrb[4].mxu1 %vm541_vm3, %v765_v33 }
 0x2ac   : > { %1464 = vmatpush3.bf16.xpose.msra.mxu1 %v882_v36  ;;  %1465 = vmatprep.mubr.msk.bf16.mxu1 %vm1583_vm1, %v1582_v8 }
 0x2ad   : > { %1475 = vmatprep.subr.bf16.mxu1 %v1582_v8 }
 0x2b3   : > { %1466 = vmatmul.mubr.msk.bf16.vlgmr.msra.gmra.mrb[8].mxu1 %vm541_vm3, %v875_v37 }
 0x2b4   : > { %1479 = vmatprep.mubr.msk.bf16.mxu1 %vm1583_vm1, %v1582_v8 }
 0x372   : > { %v582_v38 = vpop.f32.mrb[4].mxu0 }
 0x373   : > { %v1431_v39 = vpop.f32.mrb[5].mxu0  ;;  %v589_v40 = vsel %vm588_vm4, %v582_v38, -inf }
 0x374   : > { %590 = vmax.xlane.f32.xlu1 %v589_v40  ;;  %v585_v41 = vpop.f32.mrb[6].mxu0 }
 0x375   : > { %v1432_v42 = vpop.f32.mrb[7].mxu0 }
 0x376   : > { %v698_v43 = vpop.f32.mrb[0].mxu1 }
 0x377   : > { %v1443_v44 = vpop.f32.mrb[1].mxu1  ;;  %v704_v45 = vsel %vm588_vm4, %v698_v43, -inf }
 0x378   : > { %705 = vmax.xlane.f32.xlu0 %v704_v45  ;;  %v701_v46 = vpop.f32.mrb[2].mxu1 }
 0x379   : > { %v1444_v47 = vpop.f32.mrb[3].mxu1 }
 0x37e   : > { %v808_v48 = vpop.f32.mrb[4].mxu1 }
 0x37f   : > { %v1455_v49 = vpop.f32.mrb[5].mxu1  ;;  %v814_v50 = vsel %vm588_vm4, %v808_v48, -inf }
 0x380   : > { %v811_v51 = vpop.f32.mrb[6].mxu1  ;;  %815 = vmax.xlane.f32.xlu1 %v814_v50 }
 0x381   : > { %v1456_v52 = vpop.f32.mrb[7].mxu1  ;;  %v1538_v51 = vld [vmem:[%s1863_s5] sm:$0xff]  }
 0x382   : > { %1476 = vmatpush3.bf16.msra.mxu1 %v1538_v51  ;;  %v1539_v52 = vld [vmem:[%s1863_s5 + $0x8] sm:$0xff]   ;;  %v1382_v51 = vld [vmem:[%s1870_s12] ss:$0 sm:$0xff] }
 0x383   : > { %1477 = vmatprep.subr.bf16.mxu1 %v1582_v8 }
 0x386   : > { %v918_v53 = vpop.f32.mrb[8].mxu1  ;;  %1478 = vmatpush3.bf16.msra.mxu1 %v1539_v52 }
 0x387   : > { %v1467_v54 = vpop.f32.mrb[9].mxu1  ;;  %v924_v55 = vsel %vm588_vm4, %v918_v53, -inf  ;;  %1491 = vmatprep.subr.bf16.mxu1 %v1582_v8 }
 0x388   : > { %925 = vmax.xlane.f32.xlu0 %v924_v55  ;;  %v921_v56 = vpop.f32.mrb[10].mxu1 }
 0x389   : > { %v1468_v57 = vpop.f32.mrb[11].mxu1 }
 0x401   : > { %v591_v58 = vpop.xlane.xlu1 %590 }
 0x402   : > { %v592_v59 = vsub.f32 %v582_v38, %v591_v58 }
 0x404   : > { %v593_v60 = vmul.f32 1.442695, %v592_v59 }
 0x405   : > { %v706_v61 = vpop.xlane.xlu0 %705 }
 0x406   : > { %1552 = vpow2.f32 %v593_v60  ;;  %v707_v62 = vsub.f32 %v698_v43, %v706_v61 }
 0x408   : > { %v708_v63 = vmul.f32 1.442695, %v707_v62 }
 0x40a   : > { %1554 = vpow2.f32 %v708_v63 }
 0x40d   : > { %v816_v5 = vpop.xlane.xlu1 %815 }
 0x40e   : > { %v817_v6 = vsub.f32 %v808_v48, %v816_v5 }
 0x410   : > { %v1553_v1 = vpop.eup %1552  ;;  %v818_v9 = vmul.f32 1.442695, %v817_v6  ;;  %v1366_v6 = vld [vmem:[%s1864_s6] ss:$0 sm:$0xff] }
 0x411   : > { %v595_v2 = vsel %vm588_vm4, %v1553_v1, 0.0 }
 0x412   : > { %596 = vadd.xlane.f32.xlu1 %v595_v2  ;;  %1556 = vpow2.f32 %v818_v9 }
 0x414   : > { %v1555_v3 = vpop.eup %1554 }
 0x415   : > { %v710_v4 = vsel %vm588_vm4, %v1555_v3, 0.0  ;;  %v926_v7 = vpop.xlane.xlu0 %925 }
 0x416   : > { %711 = vadd.xlane.f32.xlu0 %v710_v4  ;;  %v927_v10 = vsub.f32 %v918_v53, %v926_v7 }
 0x418   : > { %v928_v11 = vmul.f32 1.442695, %v927_v10 }
 0x41a   : > { %1558 = vpow2.f32 %v928_v11 }
 0x41c   : > { %v1557_v12 = vpop.eup %1556 }
 0x41d   : > { %v820_v13 = vsel %vm588_vm4, %v1557_v12, 0.0 }
 0x423   : > { %716 = vrot.lane.b32.xlu1 %v1717_v25, %s1591_s17 }
 0x424   : > { %v1559_v14 = vpop.eup %1558 }
 0x425   : > { %v930_v15 = vsel %vm588_vm4, %v1559_v14, 0.0 }
 0x42c   : > { %601 = vrot.lane.b32.xlu0 %v1717_v25, %s1592_s18  ;;  %s435_s18 = scalar_lea.vmem %s1871_s13, %s1347_s27 }
 0x430   : > { %826 = vrot.lane.b32.xlu0 %v1717_v25, %s1593_s19 }
 0x447   : > { %821 = vadd.xlane.f32.xlu1 %v820_v13 }
 0x44b   : > { %931 = vadd.xlane.f32.xlu1 %v930_v15 }
 0x45c   : > { %936 = vrot.lane.b32.xlu1 %v1717_v25, %s1594_s20 }
 0x49f   : > { %v597_v16 = vpop.xlane.xlu1 %596 }
 0x4a0   : > { %1560 = vrcp.f32 %v597_v16 }
 0x4a3   : > { %v712_v17 = vpop.xlane.xlu0 %711  ;;  %v717_v26 = vpop.permute.xlu1 %716 }
 0x4a4   : > { %1562 = vrcp.f32 %v712_v17  ;;  %v722_v28 = vand.u32 %v717_v26, %v610_v20 }
 0x4a7   : > { %v602_v21 = vpop.permute.xlu0 %601 }
 0x4a8   : > { %v612_v22 = vand.u32 %v610_v20, %v602_v21 }
 0x4aa   : > { %v1561_v23 = vpop.eup %1560  ;;  %1434 = vmatpush3.bf16.msra.mxu0 %v612_v22 }
 0x4ab   : > { %v599_v24 = vmul.f32 %v1561_v23, %v1553_v1  ;;  %1445 = vmatprep.subr.bf16.mxu0 %v1582_v8  ;;  %v827_v30 = vpop.permute.xlu0 %826 }
 0x4ac   : > { %v832_v32 = vand.u32 %v827_v30, %v610_v20  ;;  %v1542_v30 = vld [vmem:[%s1869_s11] sm:$0xff]  }
 0x4ad   : > { %v600_v27 = vpack.c.bf16 %v599_v24, %v599_v24  ;;  %v1367_v24 = vld [vmem:[%s1865_s7] ss:$0 sm:$0xff] }
 0x4ae   : > { %v1563_v25 = vpop.eup %1562 }
 0x4af   : > { %1436 = vmatmul.mubr.msk.bf16.vlgmr.msra.gmra.mrb[8].mxu0 %vm603_vm7, %v600_v27  ;;  %v714_v29 = vmul.f32 %v1563_v25, %v1555_v3  ;;  %v1368_v27 = vld [vmem:[%s1866_s8] ss:$0 sm:$0xff] }
 0x4b0   : > { %1446 = vmatpush3.bf16.msra.mxu0 %v722_v28  ;;  %1447 = vmatprep.mubr.msk.bf16.mxu0 %vm1583_vm1, %v1582_v8 }
 0x4b1   : > { %1457 = vmatprep.subr.bf16.mxu0 %v1582_v8  ;;  %v715_v31 = vpack.c.bf16 %v714_v29, %v714_v29 }
 0x4b7   : > { %1448 = vmatmul.mubr.msk.bf16.vlgmr.msra.gmra.mrb[12].mxu0 %vm603_vm7, %v715_v31  ;;  %v1543_v31 = vld [vmem:[%s1869_s11 + $0x8] sm:$0xff]  }
 0x4b8   : > { %1458 = vmatpush3.bf16.msra.mxu0 %v832_v32  ;;  %1459 = vmatprep.mubr.msk.bf16.mxu0 %vm1583_vm1, %v1582_v8  ;;  %v1544_v32 = vld [vmem:[%s1869_s11 + $0x10] sm:$0xff]  }
 0x4b9   : > { %1469 = vmatprep.subr.bf16.mxu0 %v1582_v8 }
 0x4d4   : > { %v822_v33 = vpop.xlane.xlu1 %821 }
 0x4d5   : > { %1564 = vrcp.f32 %v822_v33  ;;  %v1545_v33 = vld [vmem:[%s1869_s11 + $0x18] sm:$0xff]  }
 0x4d8   : > { %v932_v34 = vpop.xlane.xlu1 %931 }
 0x4d9   : > { %1566 = vrcp.f32 %v932_v34  ;;  %v1546_v34 = vld [vmem:[%s1869_s11 + $0x20] sm:$0xff]  }
 0x4dc   : > { %v937_v37 = vpop.permute.xlu1 %936 }
 0x4dd   : > { %v942_v40 = vand.u32 %v937_v37, %v610_v20  ;;  %v1549_v37 = vld [vmem:[%s1869_s11 + $0x38] sm:$0xff]  }
 0x4df   : > { %v1565_v35 = vpop.eup %1564 }
 0x4e0   : > { %v824_v36 = vmul.f32 %v1565_v35, %v1557_v12  ;;  %v1547_v35 = vld [vmem:[%s1869_s11 + $0x28] sm:$0xff]  }
 0x4e2   : > { %v825_v38 = vpack.c.bf16 %v824_v36, %v824_v36  ;;  %v1548_v36 = vld [vmem:[%s1869_s11 + $0x30] sm:$0xff]  }
 0x4e3   : > { %v1567_v39 = vpop.eup %1566 }
 0x4e4   : > { %1460 = vmatmul.mubr.msk.bf16.vlgmr.msra.gmra.mrb[16].mxu0 %vm603_vm7, %v825_v38  ;;  %v934_v41 = vmul.f32 %v1567_v39, %v1559_v14  ;;  %v1369_v38 = vld [vmem:[%s1868_s10] ss:$0 sm:$0xff] }
 0x4e5   : > { %1470 = vmatpush3.bf16.msra.mxu0 %v942_v40  ;;  %1471 = vmatprep.mubr.msk.bf16.mxu0 %vm1583_vm1, %v1582_v8 }
 0x4e6   : > { %1483 = vmatprep.subr.bf16.mxu0 %v1582_v8  ;;  %v935_v42 = vpack.c.bf16 %v934_v41, %v934_v41 }
 0x4ec   : > { %1472 = vmatmul.mubr.msk.bf16.vlgmr.msra.gmra.mrb[20].mxu0 %vm603_vm7, %v935_v42 }
 0x4ed   : > { %1487 = vmatprep.mubr.msk.bf16.mxu0 %vm1583_vm1, %v1582_v8 }
 0x582   : > { %v648_v43 = vpop.f32.mrb[8].mxu0 }
 0x583   : > { %v1437_v44 = vpop.f32.mrb[9].mxu0 }
 0x584   : > { %v651_v45 = vpop.f32.mrb[10].mxu0 }
 0x585   : > { %v1438_v46 = vpop.f32.mrb[11].mxu0 }
 0x58a   : > { %v758_v47 = vpop.f32.mrb[12].mxu0 }
 0x58b   : > { %985 = vrot.lane.b32.xlu0 %v758_v47, %s1596_s21  ;;  %v1449_v48 = vpop.f32.mrb[13].mxu0 }
 0x58c   : > { %v761_v49 = vpop.f32.mrb[14].mxu0 }
 0x58d   : > { %v1450_v50 = vpop.f32.mrb[15].mxu0 }
 0x5b7   : > { %v868_v53 = vpop.f32.mrb[16].mxu0 }
 0x5b8   : > { %989 = vrot.lane.b32.xlu1 %v868_v53, %s1597_s29  ;;  %v1461_v54 = vpop.f32.mrb[17].mxu0 }
 0x5b9   : > { %v871_v55 = vpop.f32.mrb[18].mxu0 }
 0x5ba   : > { %v1462_v56 = vpop.f32.mrb[19].mxu0 }
 0x5bf   : > { %v978_v57 = vpop.f32.mrb[20].mxu0 }
 0x5c0   : > { %993 = vrot.lane.b32.xlu0 %v978_v57, %s1598_s30  ;;  %v1473_v58 = vpop.f32.mrb[21].mxu0 }
 0x5c1   : > { %v981_v59 = vpop.f32.mrb[22].mxu0 }
 0x5c2   : > { %v1474_v60 = vpop.f32.mrb[23].mxu0 }
 0x5fd   : > { %v986_v61 = vpop.permute.xlu0 %985 }
 0x5fe   : > { %v996_v63 = vsel %vm541_vm3, %v648_v43, %v986_v61 }
 0x62a   : > { %v990_v62 = vpop.permute.xlu1 %989 }
 0x62b   : > { %v998_v1 = vsel %vm997_vm8, %v996_v63, %v990_v62 }
 0x632   : > { %v994_v2 = vpop.permute.xlu0 %993 }
 0x633   : > { %v1000_v3 = vsel %vm999_vm9, %v998_v1, %v994_v2 }
 0x634   : > { %v1001_v4 = vpack.c.bf16 %v1000_v3, %v1000_v3 }
 0x636   : > { %1480 = vmatmul.mubr.msk.bf16.vlgmr.msra.gmra.mrb[12].mxu1 %vm493_vm2, %v1001_v4 }
 0x637   : > { %1507 = vmatprep.mubr.msk.bf16.mxu1 %vm1583_vm1, %v1582_v8  ;;  %1492 = vmatpush3.bf16.msra.mxu1 %v1542_v30 }
 0x638   : > { %1493 = vmatprep.subr.bf16.mxu1 %v1582_v8 }
 0x63b   : > { %1494 = vmatpush3.bf16.msra.mxu1 %v1543_v31 }
 0x63c   : > { %1495 = vmatprep.subr.bf16.mxu1 %v1582_v8 }
 0x63f   : > { %1496 = vmatpush3.bf16.msra.mxu1 %v1544_v32 }
 0x640   : > { %1497 = vmatprep.subr.bf16.mxu1 %v1582_v8 }
 0x643   : > { %1498 = vmatpush3.bf16.msra.mxu1 %v1545_v33 }
 0x644   : > { %1499 = vmatprep.subr.bf16.mxu1 %v1582_v8 }
 0x647   : > { %1500 = vmatpush3.bf16.msra.mxu1 %v1546_v34 }
 0x648   : > { %1501 = vmatprep.subr.bf16.mxu1 %v1582_v8 }
 0x64b   : > { %1502 = vmatpush3.bf16.msra.mxu1 %v1547_v35 }
 0x64c   : > { %1503 = vmatprep.subr.bf16.mxu1 %v1582_v8 }
 0x64f   : > { %1504 = vmatpush3.bf16.msra.mxu1 %v1548_v36 }
 0x650   : > { %1505 = vmatprep.subr.bf16.mxu1 %v1582_v8 }
 0x653   : > { %1506 = vmatpush3.bf16.msra.mxu1 %v1549_v37 }
 0x709   : > { %v1055_v5 = vpop.f32.mrb[12].mxu1 }
 0x70a   : > { %v1061_v7 = vadd.f32 %v1055_v5, %v1685_v0  ;;  %v1481_v9 = vpop.f32.mrb[13].mxu1  ;;  %v1540_v0 = vld [vmem:[%s1867_s9] sm:$0xff]  }
 0x70b   : > { %v1058_v10 = vpop.f32.mrb[14].mxu1  ;;  %1484 = vmatpush3.bf16.msra.mxu0 %v1540_v0 }
 0x70c   : > { %v1791_v11 = vadd.f32 %v1366_v6, %v1061_v7  ;;  %v1482_v12 = vpop.f32.mrb[15].mxu1  ;;  %1485 = vmatprep.subr.bf16.mxu0 %v1582_v8 }
 0x70e   : > { %v1072_v13 = vsel %vm440_vm0, %v1791_v11, 0.0 }
 0x70f   : > { %1073 = vadd.xlane.f32.xlu1 %v1072_v13  ;;  %1486 = vmatpush3.bf16.msra.mxu0 %v1541_v19 }
 0x79c   : > { %v1074_v14 = vpop.xlane.xlu1 %1073 }
 0x79d   : > { %v1075_v15 = vmul.f32 0.03125, %v1074_v14 }
 0x79f   : > { %v1076_v16 = vsub.f32 %v1791_v11, %v1075_v15 }
 0x7a1   : > { %v1077_v17 = vmul.f32 %v1076_v16, %v1076_v16 }
 0x7a3   : > { %v1078_v18 = vsel %vm440_vm0, %v1077_v17, 0.0 }
 0x7a4   : > { %1079 = vadd.xlane.f32.xlu0 %v1078_v18 }
 0x831   : > { %v1080_v20 = vpop.xlane.xlu0 %1079 }
 0x832   : > { %v1081_v21 = vmul.f32 0.03125, %v1080_v20 }
 0x834   : > { %v1082_v22 = vadd.f32 1e-05, %v1081_v21 }
 0x836   : > { %1568 = vrsqrt.f32 %v1082_v22 }
 0x840   : > { %v1569_v23 = vpop.eup %1568 }
 0x841   : > { %v1084_v26 = vmul.f32 %v1569_v23, %v1076_v16 }
 0x843   : > { %v1091_v25 = vmul.f32 %v1367_v24, %v1084_v26 }
 0x845   : > { %v1098_v28 = vadd.f32 %v1368_v27, %v1091_v25 }
 0x847   : > { %v1099_v29 = vpack.c.bf16 %v1098_v28, %v1098_v28 }
 0x849   : > { %1488 = vmatmul.mubr.msk.bf16.vlgmr.msra.gmra.mrb[24].mxu0 %vm493_vm2, %v1099_v29 }
 0x91c   : > { %v1160_v39 = vpop.f32.mrb[24].mxu0 }
 0x91d   : > { %v1161_v40 = vadd.f32 %v1369_v38, %v1160_v39  ;;  %v1489_v41 = vpop.f32.mrb[25].mxu0 }
 0x91e   : > { %v1163_v42 = vpop.f32.mrb[26].mxu0 }
 0x91f   : > { %v1373_v43 = vmul.f32 -1.702, %v1161_v40  ;;  %v1490_v44 = vpop.f32.mrb[27].mxu0 }
 0x921   : > { %v1168_v45 = vmul.f32 1.442695, %v1373_v43 }
 0x923   : > { %1570 = vpow2.f32 %v1168_v45 }
 0x92d   : > { %v1571_v46 = vpop.eup %1570 }
 0x92e   : > { %v1170_v8 = vadd.f32 1.0, %v1571_v46 }
 0x930   : > { %1572 = vrcp.f32 %v1170_v8 }
 0x93a   : > { %v1573_v47 = vpop.eup %1572 }
 0x93b   : > { %v1173_v48 = vmul.f32 %v1573_v47, %v1161_v40 }
 0x93d   : > { %v1174_v49 = vpack.c.bf16 %v1173_v48, %v1173_v48 }
 0x93f   : > { %1508 = vmatmul.mubr.bf16.vlgmr.msra.gmra.mrb[16].mxu1 %v1174_v49 }
 0xa12   : > { %v1273_v50 = vpop.f32.mrb[16].mxu1 }
 0xa13   : > { %v1279_v52 = vadd.f32 %v1273_v50, %v1791_v11  ;;  %v1509_v53 = vpop.f32.mrb[17].mxu1 }
 0xa14   : > { %v1276_v54 = vpop.f32.mrb[18].mxu1 }
 0xa15   : > { %v1287_v55 = vadd.f32 %v1382_v51, %v1279_v52  ;;  %v1510_v56 = vpop.f32.mrb[19].mxu1 }
 0xa17   : > { %1288 = vst.msk [vmem:[%s435_s18] sm:$0x1f] %vm440_vm0, %v1287_v55 }
 0xa18 PF: > { %s23_s25 = sadd.s32 1, %s1580_s25  }
 0xa19   : > { %p20_p4 = scmp.ge.s32.totalorder %s23_s25, 6  }
 0xa1b   :  { %22 = sbr.rel (!%p20_p4) target bundleno = 1 (0x1), region = 102 }

</bundles_post_ra>
